<compile_context>
chip_gen: v7x
topology: tpu7x:2x2x1
jax: 0.10.0
libtpu: 0.0.40
codegen_flags: <defaults>
</compile_context>

<pallas_src>
import math

import jax
import jax.numpy as jnp
from jax.experimental import pallas as pl
from jax.experimental.pallas import tpu as pltpu

FREQ_EMB = 256   # frequency_embedding_size of TimestepEmbedder
EPS = 1e-6       # LayerNorm eps used throughout the module (in_ln and norm_final)


def _round_up(v, m):
    return ((v + m - 1) // m) * m


def _cdiv(a, b):
    return -(-a // b)


def _silu(x):
    # x * sigmoid(x); sigmoid via tanh (EUP path, no overflow for large |x|).
    return x * (0.5 * (jnp.tanh(0.5 * x) + 1.0))


def _layernorm(x):
    mu = jnp.mean(x, axis=-1, keepdims=True)
    xc = x - mu
    var = jnp.mean(xc * xc, axis=-1, keepdims=True)
    return xc * jax.lax.rsqrt(var + EPS)


def _buffered_supported():
    """True if BlockSpec accepts pipeline_mode=pl.Buffered(1) (construction-time probe)."""
    try:
        pl.BlockSpec((8, 128), lambda i: (0, 0), pipeline_mode=pl.Buffered(1))
        return True
    except Exception:  # noqa: BLE001 - any failure -> fall back to default buffering
        return False


_SINGLE_BUFFER_OK = _buffered_supported()


def _single_buffered_spec(shape, index_map):
    """BlockSpec with a single VMEM buffer (constant-index inputs); safe fallback."""
    if _SINGLE_BUFFER_OK:
        try:
            return pl.BlockSpec(shape, index_map, pipeline_mode=pl.Buffered(1))
        except TypeError:
            pass
    return pl.BlockSpec(shape, index_map)


def _make_kernel(C, resident):
    """Build the fused kernel; `C` and `resident` are Python statics (closure)."""
    f32 = jnp.float32
    bf16 = jnp.bfloat16

    def kernel(
            # batch-tiled inputs
            t_ref, x_ref, c_ref,
            # constant (layer-independent) weights; matmul weights in bf16
            ip_w, ip_b, te_w0, te_b0, te_w2, te_b2, ce_w, ce_b,
            f_ada_w, f_ada_b, f_lw, f_lb,
            # per-res-block weights (streamed one layer per grid step, or resident)
            ada_w, w1, w2, small,
            # output
            out_ref,
            # scratch carried across the res-block grid axis
            x_sc, st_sc):
        l = pl.program_id(1)
        n_layers = pl.num_programs(1)

        # ---------------- prologue: embeddings + input projection ----------------
        @pl.when(l == 0)
        def _prologue():
            half = FREQ_EMB // 2
            k = jax.lax.broadcasted_iota(jnp.int32, (1, half), 1).astype(f32)
            freqs = jnp.exp((-math.log(10000.0) / half) * k)                 # [1, half]
            args = t_ref[...] * freqs                                        # [bn, half]
            temb = jnp.concatenate([jnp.cos(args), jnp.sin(args)], axis=-1)  # [bn, FREQ]

            h = jnp.dot(temb.astype(bf16), te_w0[...],
                        preferred_element_type=f32) + te_b0[...]
            t_emb = jnp.dot(_silu(h).astype(bf16), te_w2[...],
                            preferred_element_type=f32) + te_b2[...]
            c_emb = jnp.dot(c_ref[...].astype(bf16), ce_w[...],
                            preferred_element_type=f32) + ce_b[...]
            st_sc[...] = _silu(t_emb + c_emb).astype(st_sc.dtype)            # bf16 scratch
            x_sc[...] = jnp.dot(x_ref[...].astype(bf16), ip_w[...],
                                preferred_element_type=f32) + ip_b[...]

        # ---------------- residual block `l` ----------------
        if resident:   # full [L, ...] stacks resident in VMEM; dynamic layer index
            aw, w1l, w2l, sm = ada_w[l], w1[l], w2[l], small[l]
        else:          # one layer streamed per grid step (leading dim squeezed away)
            aw, w1l, w2l, sm = ada_w[...], w1[...], w2[...], small[...]
        # sm rows: 0 ln_gamma, 1 ln_beta, 2 shift_b, 3 scale_b, 4 gate_b, 5 b1, 6 b2

        x = x_sc[...]                                                        # f32 [bn,C]
        st = st_sc[...]                                                      # bf16 [bn,C]
        scg = jnp.dot(st, aw, preferred_element_type=f32)                    # [bn, 3C]
        shift = scg[:, 0:C] + sm[2:3, :]
        scale = scg[:, C:2 * C] + sm[3:4, :]
        gate = (scg[:, 2 * C:3 * C] + sm[4:5, :]).astype(bf16)               # bf16: trims
        h = _layernorm(x) * sm[0:1, :] + sm[1:2, :]                          # in_ln affine
        h = h * (1.0 + scale) + shift                                        # modulate
        h = _silu(jnp.dot(h.astype(bf16), w1l,
                          preferred_element_type=f32) + sm[5:6, :])
        h = jnp.dot(h.astype(bf16), w2l,
                    preferred_element_type=f32) + sm[6:7, :]
        x_sc[...] = x + gate.astype(f32) * h

        # ---------------- final layer (AdaLN, LayerNorm without affine) ----------------
        @pl.when(l == n_layers - 1)
        def _final():
            stf = st_sc[...]
            sc2 = jnp.dot(stf, f_ada_w[...], preferred_element_type=f32) + f_ada_b[...]
            hf = _layernorm(x_sc[...]) * (1.0 + sc2[:, C:2 * C]) + sc2[:, 0:C]
            out_ref[...] = (jnp.dot(hf.astype(bf16), f_lw[...],
                                    preferred_element_type=f32)
                            + f_lb[...]).astype(out_ref.dtype)

    return kernel


def simple_mlp_adaln_forward(params, x, t, c, *, block_n=1024,
                             resident_layer_weights=None,
                             vmem_budget_bytes=48 * 1024 * 1024):
    """Pallas forward of SimpleMLPAdaLN (cond_method='adaln').

    block_n:     target batch tile (raise towards 1024 on v6e; on v7x pick a value
                 that yields >= 2 tiles so both TensorCores get work).
    resident_layer_weights: None=auto; True keeps all [L,...] stacks in VMEM.
    """
    N, in_ch = x.shape
    z_ch = c.shape[1]
    C = params["ip_w"].shape[1]
    out_ch = params["f_lw"].shape[1]
    L = params["bl_w1"].shape[0]
    assert L >= 1

    out_pad = _round_up(out_ch, 128)          # lane-dense output stores

    bf = lambda w: w.astype(jnp.bfloat16)     # matmul weights -> bf16 (f32 accum in-kernel)
    f32c = lambda w: w.astype(jnp.float32)
    f_lw_pad = jnp.pad(params["f_lw"], ((0, 0), (0, out_pad - out_ch)))
    f_lb_pad = jnp.pad(params["f_lb"], ((0, 0), (0, out_pad - out_ch)))

    const_params = [
        bf(params["ip_w"]), f32c(params["ip_b"]),
        bf(params["te_w0"]), f32c(params["te_b0"]),
        bf(params["te_w2"]), f32c(params["te_b2"]),
        bf(params["ce_w"]), f32c(params["ce_b"]),
        bf(params["f_ada_w"]), f32c(params["f_ada_b"]),
        bf(f_lw_pad), f32c(f_lb_pad),
    ]
    # Pack the 7 tiny per-layer [1, C] tensors into one [L, 8, C] streamed array.
    ada_b = params["bl_ada_b"]                # [L, 1, 3C]
    small = jnp.concatenate(
        [params["bl_lnw"], params["bl_lnb"],
         ada_b[:, :, 0:C], ada_b[:, :, C:2 * C], ada_b[:, :, 2 * C:3 * C],
         params["bl_b1"], params["bl_b2"],
         jnp.zeros((L, 1, C), jnp.float32)], axis=1).astype(jnp.float32)     # [L, 8, C]
    layer_params = [bf(params["bl_ada_w"]), bf(params["bl_w1"]),
                    bf(params["bl_w2"]), small]

    const_bytes = sum(int(a.size) * a.dtype.itemsize for a in const_params)
    layer_total_bytes = sum(int(a.size) * a.dtype.itemsize for a in layer_params)
    layer_step_bytes = layer_total_bytes // L
    cfac = 1 if _SINGLE_BUFFER_OK else 2      # constant-input buffer count

    # ---- batch tile selection: balanced tiles, shrunk to fit the VMEM budget ----
    n_tiles = max(1, _cdiv(N, block_n))
    bn = _round_up(_cdiv(N, n_tiles), 8)

    if resident_layer_weights is None:
        resident = (n_tiles > 1) and (cfac * layer_total_bytes <= 24 * 1024 * 1024)
    else:
        resident = bool(resident_layer_weights)

    def est_vmem(bn_, resident_):
        act = 2 * bn_ * (1 + in_ch + z_ch) * 4 + 2 * bn_ * out_pad * 4       # I/O buffers
        scr = bn_ * C * 4 + bn_ * C * 2                                      # x_sc + st_sc
        lay = cfac * layer_total_bytes if resident_ else 2 * layer_step_bytes
        return act + scr + cfac * const_bytes + lay + (2 << 20)              # + headroom

    if resident_layer_weights is None and resident and \
            est_vmem(bn, True) > vmem_budget_bytes:
        resident = False
    while bn > 256 and est_vmem(bn, resident) > vmem_budget_bytes:
        n_tiles += 1
        bn = _round_up(_cdiv(N, n_tiles), 8)
    n_pad = bn * n_tiles

    def pad_rows(a):
        return jnp.pad(a, ((0, n_pad - N), (0, 0))) if n_pad != N else a

    t2 = pad_rows(t.astype(jnp.float32).reshape(N, 1))
    x_p = pad_rows(x.astype(jnp.float32))
    c_p = pad_rows(c.astype(jnp.float32))

    # ---- BlockSpecs ----
    def bspec(a):      # batch-tiled (block index constant across the layer axis)
        return pl.BlockSpec((bn, a.shape[1]), lambda i, l: (i, 0))

    def cspec(a):      # constant weight: fetched once, single-buffered if supported
        nd = a.ndim
        return _single_buffered_spec(a.shape, lambda i, l, _nd=nd: (0,) * _nd)

    if resident:       # whole [L, ...] stacks resident; indexed with `l` in-kernel
        def lspec(a):
            nd = a.ndim
            return _single_buffered_spec(a.shape, lambda i, l, _nd=nd: (0,) * _nd)
    else:              # one layer streamed per grid step (leading dim squeezed)
        def lspec(a):
            return pl.BlockSpec((None,) + tuple(a.shape[1:]), lambda i, l: (l, 0, 0))

    in_specs = ([bspec(t2), bspec(x_p), bspec(c_p)]
                + [cspec(a) for a in const_params]
                + [lspec(a) for a in layer_params])

    # ---- advisory cost estimate ----
    flops = int(2 * n_pad * (FREQ_EMB * C + C * C + z_ch * C + in_ch * C
                             + L * 5 * C * C + 2 * C * C + C * out_pad))
    transc = int(n_pad * (FREQ_EMB + C * (L + 3)))
    io_bytes = (sum(int(a.size) * a.dtype.itemsize for a in (t2, x_p, c_p))
                + n_pad * out_pad * 4)
    bytes_accessed = int(const_bytes
                         + layer_total_bytes * (1 if resident else n_tiles)
                         + io_bytes)

    kernel = _make_kernel(C, resident)

    out = pl.pallas_call(
        kernel,
        out_shape=jax.ShapeDtypeStruct((n_pad, out_pad), jnp.float32),
        grid=(n_tiles, L),
        in_specs=in_specs,
        out_specs=pl.BlockSpec((bn, out_pad), lambda i, l: (i, 0)),
        scratch_shapes=[pltpu.VMEM((bn, C), jnp.float32),    # residual x (f32)
                        pltpu.VMEM((bn, C), jnp.bfloat16)],  # SiLU(t_emb + c_emb)
        compiler_params=pltpu.CompilerParams(
            dimension_semantics=("parallel", "arbitrary"),
            vmem_limit_bytes=int(vmem_budget_bytes)),
        cost_estimate=pl.CostEstimate(flops=flops, transcendentals=transc,
                                      bytes_accessed=bytes_accessed),
    )(t2, x_p, c_p, *const_params, *layer_params)

    return out[:N, :out_ch]


# ----------------------- parameter construction (synthetic) -----------------------
def init_params(key, in_ch, C, out_ch, z_ch, L):
    """Deterministic synthetic init (random — not the zero-init of the checkpoint — so the
    output is non-trivial).  The adaLN modulation weight is kept FUSED as [C, 3C]
    (shift|scale|gate, matching torch .chunk(3, -1) order) and the final one as [C, 2C]."""
    ks = iter(jax.random.split(key, 64 + 8 * L))

    def lin(din, dout):
        w = jax.random.normal(next(ks), (din, dout), jnp.float32) / math.sqrt(din)
        b = 0.1 * jax.random.normal(next(ks), (1, dout), jnp.float32)
        return w, b

    p = {}
    p["ip_w"], p["ip_b"] = lin(in_ch, C)           # input_proj
    p["te_w0"], p["te_b0"] = lin(FREQ_EMB, C)      # time_embed.mlp[0]
    p["te_w2"], p["te_b2"] = lin(C, C)             # time_embed.mlp[2]
    p["ce_w"], p["ce_b"] = lin(z_ch, C)            # cond_embed

    ada_w, ada_b, w1, b1, w2, b2 = [], [], [], [], [], []
    for _ in range(L):
        w, b = lin(C, 3 * C); ada_w.append(w); ada_b.append(b)   # adaLN_modulation[-1]
        w, b = lin(C, C); w1.append(w); b1.append(b)             # mlp[0]
        w, b = lin(C, C); w2.append(w); b2.append(b)             # mlp[2]
    p["bl_ada_w"] = jnp.stack(ada_w)               # [L, C, 3C]
    p["bl_ada_b"] = jnp.stack(ada_b)               # [L, 1, 3C]
    p["bl_w1"] = jnp.stack(w1); p["bl_b1"] = jnp.stack(b1)
    p["bl_w2"] = jnp.stack(w2); p["bl_b2"] = jnp.stack(b2)
    p["bl_lnw"] = jnp.ones((L, 1, C), jnp.float32)   # in_ln affine (default ones/zeros)
    p["bl_lnb"] = jnp.zeros((L, 1, C), jnp.float32)

    p["f_ada_w"], p["f_ada_b"] = lin(C, 2 * C)     # final adaLN (shift|scale)
    p["f_lw"], p["f_lb"] = lin(C, out_ch)          # final linear
    return p


# ----------------------- pure-JAX references for verification -----------------------
def reference_forward(params, x, t, c, *, mimic_kernel_bf16=False):
    """SimpleMLPAdaLN.forward semantics.  mimic_kernel_bf16=True reproduces the kernel's
    numerics (bf16 matmul inputs/weights, f32 accumulation); False is the full-f32
    PyTorch-equivalent reference."""
    f32 = jnp.float32
    C = params["ip_w"].shape[1]
    half = FREQ_EMB // 2
    cast = (lambda a: a.astype(jnp.bfloat16)) if mimic_kernel_bf16 else \
           (lambda a: a.astype(f32))

    def dot(a, w):
        return jnp.dot(cast(a), cast(w), preferred_element_type=f32)

    freqs = jnp.exp((-math.log(10000.0) / half) * jnp.arange(half, dtype=f32))
    args = t.astype(f32)[:, None] * freqs[None]
    temb = jnp.concatenate([jnp.cos(args), jnp.sin(args)], axis=-1)

    h = _silu(dot(temb, params["te_w0"]) + params["te_b0"])
    t_emb = dot(h, params["te_w2"]) + params["te_b2"]
    c_emb = dot(c, params["ce_w"]) + params["ce_b"]
    st = _silu(t_emb + c_emb)
    xh = dot(x, params["ip_w"]) + params["ip_b"]

    L = params["bl_w1"].shape[0]
    for l in range(L):
        scg = dot(st, params["bl_ada_w"][l]) + params["bl_ada_b"][l]
        shift, scale, gate = scg[:, :C], scg[:, C:2 * C], scg[:, 2 * C:]
        hh = _layernorm(xh) * params["bl_lnw"][l] + params["bl_lnb"][l]
        hh = hh * (1.0 + scale) + shift
        hh = _silu(dot(hh, params["bl_w1"][l]) + params["bl_b1"][l])
        hh = dot(hh, params["bl_w2"][l]) + params["bl_b2"][l]
        xh = xh + gate * hh

    sc2 = dot(st, params["f_ada_w"]) + params["f_ada_b"]
    hh = _layernorm(xh) * (1.0 + sc2[:, C:]) + sc2[:, :C]
    return dot(hh, params["f_lw"]) + params["f_lb"]


if __name__ == "__main__":
    # Small shapes consistent with the module: x:[N,in_ch], t:[N], c:[N,z_ch].
    # C=128 keeps adaLN slice boundaries lane-aligned (as in production widths).
    N, in_ch, C, out_ch, z_ch, L = 16, 4, 128, 8, 16, 2

    key = jax.random.PRNGKey(0)
    kx, kt, kc, kp = jax.random.split(key, 4)
    x = jax.random.normal(kx, (N, in_ch), jnp.float32)
    t = jax.random.uniform(kt, (N,), jnp.float32, 0.0, 1000.0)
    c = jax.random.normal(kc, (N, z_ch), jnp.float32)
    params = init_params(kp, in_ch, C, out_ch, z_ch, L)

    # --- Test 1: default path (single batch tile, streamed layer weights) ---
    out = jax.block_until_ready(simple_mlp_adaln_forward(params, x, t, c))
    assert out.shape == (N, out_ch)
    ref_k = reference_forward(params, x, t, c, mimic_kernel_bf16=True)
    ref_f32 = reference_forward(params, x, t, c, mimic_kernel_bf16=False)
    err_k = float(jnp.max(jnp.abs(out - ref_k)))
    err_f = float(jnp.max(jnp.abs(out - ref_f32)))
    scale = float(jnp.max(jnp.abs(ref_f32))) + 1.0
    assert err_k < 2e-2, f"kernel vs bf16-numerics reference: max abs err {err_k}"
    assert err_f < 0.05 * scale, f"kernel vs f32 reference: max abs err {err_f} (scale {scale})"

    # --- Test 2: multi-tile batch + resident layer weights (dynamic layer indexing) ---
    N2 = 48
    x2 = jax.random.normal(jax.random.PRNGKey(1), (N2, in_ch), jnp.float32)
    t2 = jax.random.uniform(jax.random.PRNGKey(2), (N2,), jnp.float32, 0.0, 1000.0)
    c2 = jax.random.normal(jax.random.PRNGKey(3), (N2, z_ch), jnp.float32)
    out2 = jax.block_until_ready(
        simple_mlp_adaln_forward(params, x2, t2, c2, block_n=16,
                                 resident_layer_weights=True))
    assert out2.shape == (N2, out_ch)
    ref2 = reference_forward(params, x2, t2, c2, mimic_kernel_bf16=True)
    err2 = float(jnp.max(jnp.abs(out2 - ref2)))
    assert err2 < 2e-2, f"resident/multi-tile path: max abs err {err2}"

    print("KERNEL_OK")
</pallas_src>

<mosaic_0001>
module attributes {stable_mosaic.version = 11 : i64} {
  func.func @kernel(%arg0: i32, %arg1: i32, %arg2: memref<16x1xf32, #tpu.memory_space<vmem>>, %arg3: memref<16x4xf32, #tpu.memory_space<vmem>>, %arg4: memref<16x16xf32, #tpu.memory_space<vmem>>, %arg5: memref<4x128xbf16, #tpu.memory_space<vmem>>, %arg6: memref<1x128xf32, #tpu.memory_space<vmem>>, %arg7: memref<256x128xbf16, #tpu.memory_space<vmem>>, %arg8: memref<1x128xf32, #tpu.memory_space<vmem>>, %arg9: memref<128x128xbf16, #tpu.memory_space<vmem>>, %arg10: memref<1x128xf32, #tpu.memory_space<vmem>>, %arg11: memref<16x128xbf16, #tpu.memory_space<vmem>>, %arg12: memref<1x128xf32, #tpu.memory_space<vmem>>, %arg13: memref<128x256xbf16, #tpu.memory_space<vmem>>, %arg14: memref<1x256xf32, #tpu.memory_space<vmem>>, %arg15: memref<128x128xbf16, #tpu.memory_space<vmem>>, %arg16: memref<1x128xf32, #tpu.memory_space<vmem>>, %arg17: memref<1x128x384xbf16, #tpu.memory_space<vmem>>, %arg18: memref<1x128x128xbf16, #tpu.memory_space<vmem>>, %arg19: memref<1x128x128xbf16, #tpu.memory_space<vmem>>, %arg20: memref<1x8x128xf32, #tpu.memory_space<vmem>>, %arg21: memref<16x128xf32, #tpu.memory_space<vmem>>, %arg22: memref<16x128xf32, #tpu.memory_space<vmem>>, %arg23: memref<16x128xbf16, #tpu.memory_space<vmem>>) attributes {dimension_semantics = [#tpu.dimension_semantics<parallel>, #tpu.dimension_semantics<arbitrary>], iteration_bounds = array<i64: 1, 2>, scalar_prefetch = 0 : i64, scratch_operands = 2 : i64, tpu.core_type = #tpu.core_type<tc>, window_params = [{transform_indices = @transform_0, window_bounds = array<i64: 16, 1>}, {transform_indices = @transform_1, window_bounds = array<i64: 16, 4>}, {transform_indices = @transform_2, window_bounds = array<i64: 16, 16>}, {pipeline_mode = #tpu.pipeline_mode<synchronous>, transform_indices = @transform_3, window_bounds = array<i64: 4, 128>}, {pipeline_mode = #tpu.pipeline_mode<synchronous>, transform_indices = @transform_4, window_bounds = array<i64: 1, 128>}, {pipeline_mode = #tpu.pipeline_mode<synchronous>, transform_indices = @transform_5, window_bounds = array<i64: 256, 128>}, {pipeline_mode = #tpu.pipeline_mode<synchronous>, transform_indices = @transform_6, window_bounds = array<i64: 1, 128>}, {pipeline_mode = #tpu.pipeline_mode<synchronous>, transform_indices = @transform_7, window_bounds = array<i64: 128, 128>}, {pipeline_mode = #tpu.pipeline_mode<synchronous>, transform_indices = @transform_8, window_bounds = array<i64: 1, 128>}, {pipeline_mode = #tpu.pipeline_mode<synchronous>, transform_indices = @transform_9, window_bounds = array<i64: 16, 128>}, {pipeline_mode = #tpu.pipeline_mode<synchronous>, transform_indices = @transform_10, window_bounds = array<i64: 1, 128>}, {pipeline_mode = #tpu.pipeline_mode<synchronous>, transform_indices = @transform_11, window_bounds = array<i64: 128, 256>}, {pipeline_mode = #tpu.pipeline_mode<synchronous>, transform_indices = @transform_12, window_bounds = array<i64: 1, 256>}, {pipeline_mode = #tpu.pipeline_mode<synchronous>, transform_indices = @transform_13, window_bounds = array<i64: 128, 128>}, {pipeline_mode = #tpu.pipeline_mode<synchronous>, transform_indices = @transform_14, window_bounds = array<i64: 1, 128>}, {transform_indices = @transform_15, window_bounds = array<i64: 1, 128, 384>}, {transform_indices = @transform_16, window_bounds = array<i64: 1, 128, 128>}, {transform_indices = @transform_17, window_bounds = array<i64: 1, 128, 128>}, {transform_indices = @transform_18, window_bounds = array<i64: 1, 8, 128>}, {transform_indices = @transform_19, window_bounds = array<i64: 16, 128>}]} {
    %c0_i32 = arith.constant 0 : i32
    %0 = arith.cmpi eq, %arg1, %c0_i32 : i32
    %1 = arith.extui %0 : i1 to i32
    %c0_i32_0 = arith.constant 0 : i32
    %2 = arith.cmpi ne, %1, %c0_i32_0 : i32
    scf.if %2 {
      %78 = tpu.iota {dimensions = array<i32: 1>} : vector<1x128xi32>
      %79 = arith.sitofp %78 : vector<1x128xi32> to vector<1x128xf32>
      %cst_30 = arith.constant -0.0719557852 : f32
      %80 = vector.broadcast %cst_30 : f32 to vector<1x128xf32>
      %81 = arith.mulf %80, %79 : vector<1x128xf32>
      %82 = math.exp %81 : vector<1x128xf32>
      %c0_31 = arith.constant 0 : index
      %c0_32 = arith.constant 0 : index
      %83 = vector.load %arg2[%c0_31, %c0_32] : memref<16x1xf32, #tpu.memory_space<vmem>>, vector<16x1xf32>
      %84 = vector.broadcast %83 : vector<16x1xf32> to vector<16x128xf32>
      %85 = vector.broadcast %82 : vector<1x128xf32> to vector<16x128xf32>
      %86 = arith.mulf %84, %85 : vector<16x128xf32>
      %87 = math.cos %86 : vector<16x128xf32>
      %88 = math.sin %86 : vector<16x128xf32>
      %89 = tpu.concatenate %87, %88 in 1 : vector<16x128xf32>, vector<16x128xf32> -> vector<16x256xf32>
      %90 = arith.truncf %89 : vector<16x256xf32> to vector<16x256xbf16>
      %c0_33 = arith.constant 0 : index
      %c0_34 = arith.constant 0 : index
      %91 = vector.load %arg7[%c0_33, %c0_34] : memref<256x128xbf16, #tpu.memory_space<vmem>>, vector<256x128xbf16>
      %cst_35 = arith.constant dense<0.000000e+00> : vector<16x128xf32>
      %92 = tpu.matmul %90, %91, %cst_35 {dimension_numbers = #tpu.dot_dimension_numbers<[1], [0], [0], [1], [0, 0, 1, 1], [], []>} : vector<16x256xbf16>, vector<256x128xbf16>, vector<16x128xf32> -> vector<16x128xf32>
      %c0_36 = arith.constant 0 : index
      %c0_37 = arith.constant 0 : index
      %93 = vector.load %arg8[%c0_36, %c0_37] : memref<1x128xf32, #tpu.memory_space<vmem>>, vector<1x128xf32>
      %94 = vector.broadcast %93 : vector<1x128xf32> to vector<16x128xf32>
      %95 = arith.addf %92, %94 : vector<16x128xf32>
      %cst_38 = arith.constant 5.000000e-01 : f32
      %96 = vector.broadcast %cst_38 : f32 to vector<16x128xf32>
      %97 = arith.mulf %96, %95 : vector<16x128xf32>
      %98 = math.tanh %97 : vector<16x128xf32>
      %cst_39 = arith.constant 1.000000e+00 : f32
      %99 = vector.broadcast %cst_39 : f32 to vector<16x128xf32>
      %100 = arith.addf %98, %99 : vector<16x128xf32>
      %cst_40 = arith.constant 5.000000e-01 : f32
      %101 = vector.broadcast %cst_40 : f32 to vector<16x128xf32>
      %102 = arith.mulf %101, %100 : vector<16x128xf32>
      %103 = arith.mulf %95, %102 : vector<16x128xf32>
      %104 = arith.truncf %103 : vector<16x128xf32> to vector<16x128xbf16>
      %c0_41 = arith.constant 0 : index
      %c0_42 = arith.constant 0 : index
      %105 = vector.load %arg9[%c0_41, %c0_42] : memref<128x128xbf16, #tpu.memory_space<vmem>>, vector<128x128xbf16>
      %cst_43 = arith.constant dense<0.000000e+00> : vector<16x128xf32>
      %106 = tpu.matmul %104, %105, %cst_43 {dimension_numbers = #tpu.dot_dimension_numbers<[1], [0], [0], [1], [0, 0, 1, 1], [], []>} : vector<16x128xbf16>, vector<128x128xbf16>, vector<16x128xf32> -> vector<16x128xf32>
      %c0_44 = arith.constant 0 : index
      %c0_45 = arith.constant 0 : index
      %107 = vector.load %arg10[%c0_44, %c0_45] : memref<1x128xf32, #tpu.memory_space<vmem>>, vector<1x128xf32>
      %108 = vector.broadcast %107 : vector<1x128xf32> to vector<16x128xf32>
      %109 = arith.addf %106, %108 : vector<16x128xf32>
      %c0_46 = arith.constant 0 : index
      %c0_47 = arith.constant 0 : index
      %110 = vector.load %arg4[%c0_46, %c0_47] : memref<16x16xf32, #tpu.memory_space<vmem>>, vector<16x16xf32>
      %111 = arith.truncf %110 : vector<16x16xf32> to vector<16x16xbf16>
      %c0_48 = arith.constant 0 : index
      %c0_49 = arith.constant 0 : index
      %112 = vector.load %arg11[%c0_48, %c0_49] : memref<16x128xbf16, #tpu.memory_space<vmem>>, vector<16x128xbf16>
      %cst_50 = arith.constant dense<0.000000e+00> : vector<16x128xf32>
      %113 = tpu.matmul %111, %112, %cst_50 {dimension_numbers = #tpu.dot_dimension_numbers<[1], [0], [0], [1], [0, 0, 1, 1], [], []>} : vector<16x16xbf16>, vector<16x128xbf16>, vector<16x128xf32> -> vector<16x128xf32>
      %c0_51 = arith.constant 0 : index
      %c0_52 = arith.constant 0 : index
      %114 = vector.load %arg12[%c0_51, %c0_52] : memref<1x128xf32, #tpu.memory_space<vmem>>, vector<1x128xf32>
      %115 = vector.broadcast %114 : vector<1x128xf32> to vector<16x128xf32>
      %116 = arith.addf %113, %115 : vector<16x128xf32>
      %117 = arith.addf %109, %116 : vector<16x128xf32>
      %cst_53 = arith.constant 5.000000e-01 : f32
      %118 = vector.broadcast %cst_53 : f32 to vector<16x128xf32>
      %119 = arith.mulf %118, %117 : vector<16x128xf32>
      %120 = math.tanh %119 : vector<16x128xf32>
      %cst_54 = arith.constant 1.000000e+00 : f32
      %121 = vector.broadcast %cst_54 : f32 to vector<16x128xf32>
      %122 = arith.addf %120, %121 : vector<16x128xf32>
      %cst_55 = arith.constant 5.000000e-01 : f32
      %123 = vector.broadcast %cst_55 : f32 to vector<16x128xf32>
      %124 = arith.mulf %123, %122 : vector<16x128xf32>
      %125 = arith.mulf %117, %124 : vector<16x128xf32>
      %126 = arith.truncf %125 : vector<16x128xf32> to vector<16x128xbf16>
      %c0_56 = arith.constant 0 : index
      %c0_57 = arith.constant 0 : index
      %127 = vector.load %arg23[%c0_56, %c0_57] : memref<16x128xbf16, #tpu.memory_space<vmem>>, vector<16x128xbf16>
      tpu.vector_store %arg23[%c0_56, %c0_57], %126 {strides = array<i32>} : memref<16x128xbf16, #tpu.memory_space<vmem>>, vector<16x128xbf16>,
      %c0_58 = arith.constant 0 : index
      %c0_59 = arith.constant 0 : index
      %128 = vector.load %arg3[%c0_58, %c0_59] : memref<16x4xf32, #tpu.memory_space<vmem>>, vector<16x4xf32>
      %129 = arith.truncf %128 : vector<16x4xf32> to vector<16x4xbf16>
      %c0_60 = arith.constant 0 : index
      %c0_61 = arith.constant 0 : index
      %130 = vector.load %arg5[%c0_60, %c0_61] : memref<4x128xbf16, #tpu.memory_space<vmem>>, vector<4x128xbf16>
      %cst_62 = arith.constant dense<0.000000e+00> : vector<16x128xf32>
      %131 = tpu.matmul %129, %130, %cst_62 {dimension_numbers = #tpu.dot_dimension_numbers<[1], [0], [0], [1], [0, 0, 1, 1], [], []>} : vector<16x4xbf16>, vector<4x128xbf16>, vector<16x128xf32> -> vector<16x128xf32>
      %c0_63 = arith.constant 0 : index
      %c0_64 = arith.constant 0 : index
      %132 = vector.load %arg6[%c0_63, %c0_64] : memref<1x128xf32, #tpu.memory_space<vmem>>, vector<1x128xf32>
      %133 = vector.broadcast %132 : vector<1x128xf32> to vector<16x128xf32>
      %134 = arith.addf %131, %133 : vector<16x128xf32>
      %c0_65 = arith.constant 0 : index
      %c0_66 = arith.constant 0 : index
      %135 = vector.load %arg22[%c0_65, %c0_66] : memref<16x128xf32, #tpu.memory_space<vmem>>, vector<16x128xf32>
      tpu.vector_store %arg22[%c0_65, %c0_66], %134 {strides = array<i32>} : memref<16x128xf32, #tpu.memory_space<vmem>>, vector<16x128xf32>,
    } else {
    }
    %c0 = arith.constant 0 : index
    %c0_1 = arith.constant 0 : index
    %c0_2 = arith.constant 0 : index
    %3 = vector.load %arg17[%c0, %c0_1, %c0_2] : memref<1x128x384xbf16, #tpu.memory_space<vmem>>, vector<1x128x384xbf16>
    %4 = vector.shape_cast %3 : vector<1x128x384xbf16> to vector<128x384xbf16>
    %c0_3 = arith.constant 0 : index
    %c0_4 = arith.constant 0 : index
    %c0_5 = arith.constant 0 : index
    %5 = vector.load %arg18[%c0_3, %c0_4, %c0_5] : memref<1x128x128xbf16, #tpu.memory_space<vmem>>, vector<1x128x128xbf16>
    %6 = vector.shape_cast %5 : vector<1x128x128xbf16> to vector<128x128xbf16>
    %c0_6 = arith.constant 0 : index
    %c0_7 = arith.constant 0 : index
    %c0_8 = arith.constant 0 : index
    %7 = vector.load %arg19[%c0_6, %c0_7, %c0_8] : memref<1x128x128xbf16, #tpu.memory_space<vmem>>, vector<1x128x128xbf16>
    %8 = vector.shape_cast %7 : vector<1x128x128xbf16> to vector<128x128xbf16>
    %c0_9 = arith.constant 0 : index
    %c0_10 = arith.constant 0 : index
    %c0_11 = arith.constant 0 : index
    %9 = vector.load %arg20[%c0_9, %c0_10, %c0_11] : memref<1x8x128xf32, #tpu.memory_space<vmem>>, vector<1x8x128xf32>
    %10 = vector.shape_cast %9 : vector<1x8x128xf32> to vector<8x128xf32>
    %c0_12 = arith.constant 0 : index
    %c0_13 = arith.constant 0 : index
    %11 = vector.load %arg22[%c0_12, %c0_13] : memref<16x128xf32, #tpu.memory_space<vmem>>, vector<16x128xf32>
    %c0_14 = arith.constant 0 : index
    %c0_15 = arith.constant 0 : index
    %12 = vector.load %arg23[%c0_14, %c0_15] : memref<16x128xbf16, #tpu.memory_space<vmem>>, vector<16x128xbf16>
    %cst = arith.constant dense<0.000000e+00> : vector<16x384xf32>
    %13 = tpu.matmul %12, %4, %cst {dimension_numbers = #tpu.dot_dimension_numbers<[1], [0], [0], [1], [0, 0, 1, 1], [], []>} : vector<16x128xbf16>, vector<128x384xbf16>, vector<16x384xf32> -> vector<16x384xf32>
    %14 = vector.extract_strided_slice %13 {offsets = [0, 0], sizes = [16, 128], strides = [1, 1]} : vector<16x384xf32> to vector<16x128xf32>
    %15 = vector.extract_strided_slice %10 {offsets = [2, 0], sizes = [1, 128], strides = [1, 1]} : vector<8x128xf32> to vector<1x128xf32>
    %16 = vector.broadcast %15 : vector<1x128xf32> to vector<16x128xf32>
    %17 = arith.addf %14, %16 : vector<16x128xf32>
    %18 = vector.extract_strided_slice %13 {offsets = [0, 128], sizes = [16, 128], strides = [1, 1]} : vector<16x384xf32> to vector<16x128xf32>
    %19 = vector.extract_strided_slice %10 {offsets = [3, 0], sizes = [1, 128], strides = [1, 1]} : vector<8x128xf32> to vector<1x128xf32>
    %20 = vector.broadcast %19 : vector<1x128xf32> to vector<16x128xf32>
    %21 = arith.addf %18, %20 : vector<16x128xf32>
    %22 = vector.extract_strided_slice %13 {offsets = [0, 256], sizes = [16, 128], strides = [1, 1]} : vector<16x384xf32> to vector<16x128xf32>
    %23 = vector.extract_strided_slice %10 {offsets = [4, 0], sizes = [1, 128], strides = [1, 1]} : vector<8x128xf32> to vector<1x128xf32>
    %24 = vector.broadcast %23 : vector<1x128xf32> to vector<16x128xf32>
    %25 = arith.addf %22, %24 : vector<16x128xf32>
    %26 = arith.truncf %25 : vector<16x128xf32> to vector<16x128xbf16>
    %cst_16 = arith.constant dense<0.000000e+00> : vector<16xf32>
    %27 = vector.multi_reduction <add>, %11, %cst_16 [1] : vector<16x128xf32> to vector<16xf32>
    %28 = vector.shape_cast %27 : vector<16xf32> to vector<16x1xf32>
    %cst_17 = arith.constant 1.280000e+02 : f32
    %29 = vector.broadcast %cst_17 : f32 to vector<16x1xf32>
    %30 = arith.divf %28, %29 : vector<16x1xf32>
    %31 = vector.broadcast %30 : vector<16x1xf32> to vector<16x128xf32>
    %32 = arith.subf %11, %31 : vector<16x128xf32>
    %33 = arith.mulf %32, %32 : vector<16x128xf32>
    %cst_18 = arith.constant dense<0.000000e+00> : vector<16xf32>
    %34 = vector.multi_reduction <add>, %33, %cst_18 [1] : vector<16x128xf32> to vector<16xf32>
    %35 = vector.shape_cast %34 : vector<16xf32> to vector<16x1xf32>
    %cst_19 = arith.constant 1.280000e+02 : f32
    %36 = vector.broadcast %cst_19 : f32 to vector<16x1xf32>
    %37 = arith.divf %35, %36 : vector<16x1xf32>
    %cst_20 = arith.constant 9.99999997E-7 : f32
    %38 = vector.broadcast %cst_20 : f32 to vector<16x1xf32>
    %39 = arith.addf %37, %38 : vector<16x1xf32>
    %40 = math.rsqrt %39 : vector<16x1xf32>
    %41 = vector.broadcast %40 : vector<16x1xf32> to vector<16x128xf32>
    %42 = arith.mulf %32, %41 : vector<16x128xf32>
    %43 = vector.extract_strided_slice %10 {offsets = [0, 0], sizes = [1, 128], strides = [1, 1]} : vector<8x128xf32> to vector<1x128xf32>
    %44 = vector.broadcast %43 : vector<1x128xf32> to vector<16x128xf32>
    %45 = arith.mulf %42, %44 : vector<16x128xf32>
    %46 = vector.extract_strided_slice %10 {offsets = [1, 0], sizes = [1, 128], strides = [1, 1]} : vector<8x128xf32> to vector<1x128xf32>
    %47 = vector.broadcast %46 : vector<1x128xf32> to vector<16x128xf32>
    %48 = arith.addf %45, %47 : vector<16x128xf32>
    %cst_21 = arith.constant 1.000000e+00 : f32
    %49 = vector.broadcast %cst_21 : f32 to vector<16x128xf32>
    %50 = arith.addf %49, %21 : vector<16x128xf32>
    %51 = arith.mulf %48, %50 : vector<16x128xf32>
    %52 = arith.addf %51, %17 : vector<16x128xf32>
    %53 = arith.truncf %52 : vector<16x128xf32> to vector<16x128xbf16>
    %cst_22 = arith.constant dense<0.000000e+00> : vector<16x128xf32>
    %54 = tpu.matmul %53, %6, %cst_22 {dimension_numbers = #tpu.dot_dimension_numbers<[1], [0], [0], [1], [0, 0, 1, 1], [], []>} : vector<16x128xbf16>, vector<128x128xbf16>, vector<16x128xf32> -> vector<16x128xf32>
    %55 = vector.extract_strided_slice %10 {offsets = [5, 0], sizes = [1, 128], strides = [1, 1]} : vector<8x128xf32> to vector<1x128xf32>
    %56 = vector.broadcast %55 : vector<1x128xf32> to vector<16x128xf32>
    %57 = arith.addf %54, %56 : vector<16x128xf32>
    %cst_23 = arith.constant 5.000000e-01 : f32
    %58 = vector.broadcast %cst_23 : f32 to vector<16x128xf32>
    %59 = arith.mulf %58, %57 : vector<16x128xf32>
    %60 = math.tanh %59 : vector<16x128xf32>
    %cst_24 = arith.constant 1.000000e+00 : f32
    %61 = vector.broadcast %cst_24 : f32 to vector<16x128xf32>
    %62 = arith.addf %60, %61 : vector<16x128xf32>
    %cst_25 = arith.constant 5.000000e-01 : f32
    %63 = vector.broadcast %cst_25 : f32 to vector<16x128xf32>
    %64 = arith.mulf %63, %62 : vector<16x128xf32>
    %65 = arith.mulf %57, %64 : vector<16x128xf32>
    %66 = arith.truncf %65 : vector<16x128xf32> to vector<16x128xbf16>
    %cst_26 = arith.constant dense<0.000000e+00> : vector<16x128xf32>
    %67 = tpu.matmul %66, %8, %cst_26 {dimension_numbers = #tpu.dot_dimension_numbers<[1], [0], [0], [1], [0, 0, 1, 1], [], []>} : vector<16x128xbf16>, vector<128x128xbf16>, vector<16x128xf32> -> vector<16x128xf32>
    %68 = vector.extract_strided_slice %10 {offsets = [6, 0], sizes = [1, 128], strides = [1, 1]} : vector<8x128xf32> to vector<1x128xf32>
    %69 = vector.broadcast %68 : vector<1x128xf32> to vector<16x128xf32>
    %70 = arith.addf %67, %69 : vector<16x128xf32>
    %71 = arith.extf %26 : vector<16x128xbf16> to vector<16x128xf32>
    %72 = arith.mulf %71, %70 : vector<16x128xf32>
    %73 = arith.addf %11, %72 : vector<16x128xf32>
    %c0_27 = arith.constant 0 : index
    %c0_28 = arith.constant 0 : index
    %74 = vector.load %arg22[%c0_27, %c0_28] : memref<16x128xf32, #tpu.memory_space<vmem>>, vector<16x128xf32>
    tpu.vector_store %arg22[%c0_27, %c0_28], %73 {strides = array<i32>} : memref<16x128xf32, #tpu.memory_space<vmem>>, vector<16x128xf32>,
    %c1_i32 = arith.constant 1 : i32
    %75 = arith.cmpi eq, %arg1, %c1_i32 : i32
    %76 = arith.extui %75 : i1 to i32
    %c0_i32_29 = arith.constant 0 : i32
    %77 = arith.cmpi ne, %76, %c0_i32_29 : i32
    scf.if %77 {
      %c0_30 = arith.constant 0 : index
      %c0_31 = arith.constant 0 : index
      %78 = vector.load %arg23[%c0_30, %c0_31] : memref<16x128xbf16, #tpu.memory_space<vmem>>, vector<16x128xbf16>
      %c0_32 = arith.constant 0 : index
      %c0_33 = arith.constant 0 : index
      %79 = vector.load %arg13[%c0_32, %c0_33] : memref<128x256xbf16, #tpu.memory_space<vmem>>, vector<128x256xbf16>
      %cst_34 = arith.constant dense<0.000000e+00> : vector<16x256xf32>
      %80 = tpu.matmul %78, %79, %cst_34 {dimension_numbers = #tpu.dot_dimension_numbers<[1], [0], [0], [1], [0, 0, 1, 1], [], []>} : vector<16x128xbf16>, vector<128x256xbf16>, vector<16x256xf32> -> vector<16x256xf32>
      %c0_35 = arith.constant 0 : index
      %c0_36 = arith.constant 0 : index
      %81 = vector.load %arg14[%c0_35, %c0_36] : memref<1x256xf32, #tpu.memory_space<vmem>>, vector<1x256xf32>
      %82 = vector.broadcast %81 : vector<1x256xf32> to vector<16x256xf32>
      %83 = arith.addf %80, %82 : vector<16x256xf32>
      %c0_37 = arith.constant 0 : index
      %c0_38 = arith.constant 0 : index
      %84 = vector.load %arg22[%c0_37, %c0_38] : memref<16x128xf32, #tpu.memory_space<vmem>>, vector<16x128xf32>
      %cst_39 = arith.constant dense<0.000000e+00> : vector<16xf32>
      %85 = vector.multi_reduction <add>, %84, %cst_39 [1] : vector<16x128xf32> to vector<16xf32>
      %86 = vector.shape_cast %85 : vector<16xf32> to vector<16x1xf32>
      %cst_40 = arith.constant 1.280000e+02 : f32
      %87 = vector.broadcast %cst_40 : f32 to vector<16x1xf32>
      %88 = arith.divf %86, %87 : vector<16x1xf32>
      %89 = vector.broadcast %88 : vector<16x1xf32> to vector<16x128xf32>
      %90 = arith.subf %84, %89 : vector<16x128xf32>
      %91 = arith.mulf %90, %90 : vector<16x128xf32>
      %cst_41 = arith.constant dense<0.000000e+00> : vector<16xf32>
      %92 = vector.multi_reduction <add>, %91, %cst_41 [1] : vector<16x128xf32> to vector<16xf32>
      %93 = vector.shape_cast %92 : vector<16xf32> to vector<16x1xf32>
      %cst_42 = arith.constant 1.280000e+02 : f32
      %94 = vector.broadcast %cst_42 : f32 to vector<16x1xf32>
      %95 = arith.divf %93, %94 : vector<16x1xf32>
      %cst_43 = arith.constant 9.99999997E-7 : f32
      %96 = vector.broadcast %cst_43 : f32 to vector<16x1xf32>
      %97 = arith.addf %95, %96 : vector<16x1xf32>
      %98 = math.rsqrt %97 : vector<16x1xf32>
      %99 = vector.broadcast %98 : vector<16x1xf32> to vector<16x128xf32>
      %100 = arith.mulf %90, %99 : vector<16x128xf32>
      %101 = vector.extract_strided_slice %83 {offsets = [0, 128], sizes = [16, 128], strides = [1, 1]} : vector<16x256xf32> to vector<16x128xf32>
      %cst_44 = arith.constant 1.000000e+00 : f32
      %102 = vector.broadcast %cst_44 : f32 to vector<16x128xf32>
      %103 = arith.addf %102, %101 : vector<16x128xf32>
      %104 = arith.mulf %100, %103 : vector<16x128xf32>
      %105 = vector.extract_strided_slice %83 {offsets = [0, 0], sizes = [16, 128], strides = [1, 1]} : vector<16x256xf32> to vector<16x128xf32>
      %106 = arith.addf %104, %105 : vector<16x128xf32>
      %107 = arith.truncf %106 : vector<16x128xf32> to vector<16x128xbf16>
      %c0_45 = arith.constant 0 : index
      %c0_46 = arith.constant 0 : index
      %108 = vector.load %arg15[%c0_45, %c0_46] : memref<128x128xbf16, #tpu.memory_space<vmem>>, vector<128x128xbf16>
      %cst_47 = arith.constant dense<0.000000e+00> : vector<16x128xf32>
      %109 = tpu.matmul %107, %108, %cst_47 {dimension_numbers = #tpu.dot_dimension_numbers<[1], [0], [0], [1], [0, 0, 1, 1], [], []>} : vector<16x128xbf16>, vector<128x128xbf16>, vector<16x128xf32> -> vector<16x128xf32>
      %c0_48 = arith.constant 0 : index
      %c0_49 = arith.constant 0 : index
      %110 = vector.load %arg16[%c0_48, %c0_49] : memref<1x128xf32, #tpu.memory_space<vmem>>, vector<1x128xf32>
      %111 = vector.broadcast %110 : vector<1x128xf32> to vector<16x128xf32>
      %112 = arith.addf %109, %111 : vector<16x128xf32>
      %c0_50 = arith.constant 0 : index
      %c0_51 = arith.constant 0 : index
      %113 = vector.load %arg21[%c0_50, %c0_51] : memref<16x128xf32, #tpu.memory_space<vmem>>, vector<16x128xf32>
      tpu.vector_store %arg21[%c0_50, %c0_51], %112 {strides = array<i32>} : memref<16x128xf32, #tpu.memory_space<vmem>>, vector<16x128xf32>,
    } else {
    }
    return
  }
  func.func @transform_0(%arg0: i32, %arg1: i32) -> (i32, i32) {
    %c0_i32 = arith.constant 0 : i32
    %c0_i32_0 = arith.constant 0 : i32
    return %arg0, %c0_i32 : i32, i32
  }
  func.func @transform_1(%arg0: i32, %arg1: i32) -> (i32, i32) {
    %c0_i32 = arith.constant 0 : i32
    %c0_i32_0 = arith.constant 0 : i32
    return %arg0, %c0_i32 : i32, i32
  }
  func.func @transform_2(%arg0: i32, %arg1: i32) -> (i32, i32) {
    %c0_i32 = arith.constant 0 : i32
    %c0_i32_0 = arith.constant 0 : i32
    return %arg0, %c0_i32 : i32, i32
  }
  func.func @transform_3(%arg0: i32, %arg1: i32) -> (i32, i32) {
    %c0_i32 = arith.constant 0 : i32
    %c0_i32_0 = arith.constant 0 : i32
    %c0_i32_1 = arith.constant 0 : i32
    return %c0_i32, %c0_i32_0 : i32, i32
  }
  func.func @transform_4(%arg0: i32, %arg1: i32) -> (i32, i32) {
    %c0_i32 = arith.constant 0 : i32
    %c0_i32_0 = arith.constant 0 : i32
    %c0_i32_1 = arith.constant 0 : i32
    return %c0_i32, %c0_i32_0 : i32, i32
  }
  func.func @transform_5(%arg0: i32, %arg1: i32) -> (i32, i32) {
    %c0_i32 = arith.constant 0 : i32
    %c0_i32_0 = arith.constant 0 : i32
    %c0_i32_1 = arith.constant 0 : i32
    return %c0_i32, %c0_i32_0 : i32, i32
  }
  func.func @transform_6(%arg0: i32, %arg1: i32) -> (i32, i32) {
    %c0_i32 = arith.constant 0 : i32
    %c0_i32_0 = arith.constant 0 : i32
    %c0_i32_1 = arith.constant 0 : i32
    return %c0_i32, %c0_i32_0 : i32, i32
  }
  func.func @transform_7(%arg0: i32, %arg1: i32) -> (i32, i32) {
    %c0_i32 = arith.constant 0 : i32
    %c0_i32_0 = arith.constant 0 : i32
    %c0_i32_1 = arith.constant 0 : i32
    return %c0_i32, %c0_i32_0 : i32, i32
  }
  func.func @transform_8(%arg0: i32, %arg1: i32) -> (i32, i32) {
    %c0_i32 = arith.constant 0 : i32
    %c0_i32_0 = arith.constant 0 : i32
    %c0_i32_1 = arith.constant 0 : i32
    return %c0_i32, %c0_i32_0 : i32, i32
  }
  func.func @transform_9(%arg0: i32, %arg1: i32) -> (i32, i32) {
    %c0_i32 = arith.constant 0 : i32
    %c0_i32_0 = arith.constant 0 : i32
    %c0_i32_1 = arith.constant 0 : i32
    return %c0_i32, %c0_i32_0 : i32, i32
  }
  func.func @transform_10(%arg0: i32, %arg1: i32) -> (i32, i32) {
    %c0_i32 = arith.constant 0 : i32
    %c0_i32_0 = arith.constant 0 : i32
    %c0_i32_1 = arith.constant 0 : i32
    return %c0_i32, %c0_i32_0 : i32, i32
  }
  func.func @transform_11(%arg0: i32, %arg1: i32) -> (i32, i32) {
    %c0_i32 = arith.constant 0 : i32
    %c0_i32_0 = arith.constant 0 : i32
    %c0_i32_1 = arith.constant 0 : i32
    return %c0_i32, %c0_i32_0 : i32, i32
  }
  func.func @transform_12(%arg0: i32, %arg1: i32) -> (i32, i32) {
    %c0_i32 = arith.constant 0 : i32
    %c0_i32_0 = arith.constant 0 : i32
    %c0_i32_1 = arith.constant 0 : i32
    return %c0_i32, %c0_i32_0 : i32, i32
  }
  func.func @transform_13(%arg0: i32, %arg1: i32) -> (i32, i32) {
    %c0_i32 = arith.constant 0 : i32
    %c0_i32_0 = arith.constant 0 : i32
    %c0_i32_1 = arith.constant 0 : i32
    return %c0_i32, %c0_i32_0 : i32, i32
  }
  func.func @transform_14(%arg0: i32, %arg1: i32) -> (i32, i32) {
    %c0_i32 = arith.constant 0 : i32
    %c0_i32_0 = arith.constant 0 : i32
    %c0_i32_1 = arith.constant 0 : i32
    return %c0_i32, %c0_i32_0 : i32, i32
  }
  func.func @transform_15(%arg0: i32, %arg1: i32) -> (i32, i32, i32) {
    %c0_i32 = arith.constant 0 : i32
    %c0_i32_0 = arith.constant 0 : i32
    %c0_i32_1 = arith.constant 0 : i32
    return %arg1, %c0_i32, %c0_i32_0 : i32, i32, i32
  }
  func.func @transform_16(%arg0: i32, %arg1: i32) -> (i32, i32, i32) {
    %c0_i32 = arith.constant 0 : i32
    %c0_i32_0 = arith.constant 0 : i32
    %c0_i32_1 = arith.constant 0 : i32
    return %arg1, %c0_i32, %c0_i32_0 : i32, i32, i32
  }
  func.func @transform_17(%arg0: i32, %arg1: i32) -> (i32, i32, i32) {
    %c0_i32 = arith.constant 0 : i32
    %c0_i32_0 = arith.constant 0 : i32
    %c0_i32_1 = arith.constant 0 : i32
    return %arg1, %c0_i32, %c0_i32_0 : i32, i32, i32
  }
  func.func @transform_18(%arg0: i32, %arg1: i32) -> (i32, i32, i32) {
    %c0_i32 = arith.constant 0 : i32
    %c0_i32_0 = arith.constant 0 : i32
    %c0_i32_1 = arith.constant 0 : i32
    return %arg1, %c0_i32, %c0_i32_0 : i32, i32, i32
  }
  func.func @transform_19(%arg0: i32, %arg1: i32) -> (i32, i32) {
    %c0_i32 = arith.constant 0 : i32
    %c0_i32_0 = arith.constant 0 : i32
    return %arg0, %c0_i32 : i32, i32
  }
}

</mosaic_0001>

<bundles_post_ra>
// kernel: tpu_custom_call.1
= control target key start
LH: loop header
LB: loop body
LE: loop exit
PB: predicated region body
PF: predicated region fallthrough
CT: control target
= control target key end

     0   :  { %s4941_s0 = inlined_call_operand.vmem [shape: f32[16,1], index: 0, kind: input, shape index: {}]   ;;  %s4942_s1 = inlined_call_operand.vmem [shape: f32[16,4], index: 1, kind: input, shape index: {}]   ;;  %s4943_s2 = inlined_call_operand.vmem [shape: f32[16,16], index: 2, kind: input, shape index: {}]   ;;  %s4944_s3 = inlined_call_operand.hbm [shape: bf16[4,128], index: 3, kind: input, shape index: {}]   ;;  %s4945_s4 = inlined_call_operand.vmem [shape: f32[1,128], index: 4, kind: input, shape index: {}]   ;;  %s4946_s5 = inlined_call_operand.hbm [shape: bf16[256,128], index: 5, kind: input, shape index: {}]   ;;  %s4947_s6 = inlined_call_operand.hbm [shape: f32[1,128], index: 6, kind: input, shape index: {}]   ;;  %s4948_s7 = inlined_call_operand.hbm [shape: bf16[128,128], index: 7, kind: input, shape index: {}]   ;;  %s4949_s8 = inlined_call_operand.hbm [shape: f32[1,128], index: 8, kind: input, shape index: {}]   ;;  %s4950_s9 = inlined_call_operand.hbm [shape: bf16[16,128], index: 9, kind: input, shape index: {}]   ;;  %s4951_s10 = inlined_call_operand.hbm [shape: f32[1,128], index: 10, kind: input, shape index: {}]   ;;  %s4952_s11 = inlined_call_operand.hbm [shape: bf16[128,256], index: 11, kind: input, shape index: {}]   ;;  %s4953_s12 = inlined_call_operand.hbm [shape: f32[1,256], index: 12, kind: input, shape index: {}]   ;;  %s4954_s13 = inlined_call_operand.vmem [shape: bf16[128,128], index: 13, kind: input, shape index: {}]   ;;  %s4955_s14 = inlined_call_operand.hbm [shape: f32[1,128], index: 14, kind: input, shape index: {}]   ;;  %s4956_s15 = inlined_call_operand.hbm [shape: bf16[2,128,384], index: 15, kind: input, shape index: {}]   ;;  %s4957_s16 = inlined_call_operand.hbm [shape: bf16[2,128,128], index: 16, kind: input, shape index: {}]   ;;  %s4958_s17 = inlined_call_operand.hbm [shape: bf16[2,128,128], index: 17, kind: input, shape index: {}]   ;;  %s4959_s18 = inlined_call_operand.vmem [shape: f32[2,8,128], index: 18, kind: input, shape index: {}]   ;;  %s4960_s19 = inlined_call_operand.hbm [shape: f32[16,128], index: 19, kind: output, shape index: {}]  }
   0x1   :  { %4997 = sst [smem:[#allocation41_spill]] %s4941_s0 }
   0x2   :  { %4998 = sst [smem:[#allocation42_spill]] %s4942_s1 }
   0x3   :  { %4999 = sst [smem:[#allocation43_spill]] %s4943_s2 }
   0x4   :  { %5000 = sst [smem:[#allocation44_spill]] %s4944_s3 }
   0x5   :  { %5001 = sst [smem:[#allocation45_spill]] %s4945_s4 }
   0x6   :  { %5002 = sst [smem:[#allocation46_spill]] %s4946_s5 }
   0x7   :  { %5003 = sst [smem:[#allocation47_spill]] %s4947_s6 }
   0x8   :  { %5004 = sst [smem:[#allocation48_spill]] %s4948_s7 }
   0x9   :  { %5005 = sst [smem:[#allocation49_spill]] %s4954_s13 }
   0xa   :  { %5006 = sst [smem:[#allocation50_spill]] %s4955_s14 }
   0xb   :  { %5007 = sst [smem:[#allocation51_spill]] %s4956_s15 }
   0xc   :  { %5008 = sst [smem:[#allocation52_spill]] %s4959_s18 }
   0xd   :  { %5009 = sst [smem:[#allocation53_spill]] %s4960_s19 }
   0xe   :  { %24 = vsyncpa [#allocation5], 0 }
   0xf   :  { %25 = vsyncpa [#allocation8], 0 }
  0x10   :  { %26 = vsyncpa [#allocation11], 0 }
  0x11   :  { %27 = vsyncpa [#allocation14], 0 }
  0x12   :  { %28 = vsyncpa [#allocation17], 0 }
  0x13   :  { %29 = vsyncpa [#allocation20], 0 }
  0x14   :  { %30 = vsyncpa [#allocation6], 0  ;;  %s4210_s0 = smov 0   ;;  %s4212_s30 = smov 0  }
  0x15   :  { %s4214_s20 = smov 0   ;;  %s4216_s21 = smov 0  }
  0x16   :  { %s4218_s1 = smov 0   ;;  %s4220_s22 = smov 0  }
  0x17 LB: > { %5010 = sst [smem:[#allocation33_spill]] %s4055_s30  ;;  %s4241_s2 = sadd.s32 4294967295, %s4071_s22   ;;  %s4071_s22 = sphi %s4220_s22, %s36_s22   ;;  %s4067_s1 = sphi %s4218_s1, %s5080_s1   ;;  %s4063_s21 = sphi %s4216_s21, %s5079_s21   ;;  %s4059_s20 = sphi %s4214_s20, %s5078_s20   ;;  %s4055_s30 = sphi %s4212_s30, %s5077_s30   ;;  %s4051_s0 = sphi %s4210_s0, %s5074_s0  }
  0x18   : > { %5011 = sst [smem:[#allocation34_spill]] %s4063_s21  ;;  %p2907_p0 = scmp.ge.s32.totalorder %s4071_s22, 1 }
  0x19   : > { %5012 = sst [smem:[#allocation35_spill]] %s4071_s22  ;;  %p4967_p1 = scmp.eq.s32.totalorder %s4241_s2, 0 }
  0x1a   : > { %5013 = sst [smem:[#allocation36_spill]] %s4241_s2  ;;  %p513_p2 = scmp.lt.s32.totalorder %s4071_s22, 3 }
  0x1b   : > { %s4073_s24 = smov [#allocation4]   ;;  %s5017_s28 = sld [smem:[#allocation44_spill]] }
  0x1c   : > { %p4246_p3 = pnand %p2907_p0, %p513_p2  ;;  %s553_s25 = sshll.u32 %s4073_s24, 4  ;;  %s554_s25 = int_to_ptr.vmem [resolvable:$true] %s553_s25 }
  0x1e   : > { %s5014_s23 = scalar_select %p4246_p3, 1, 0 }
  0x1f   : > { %p3315_p4 = pneg %p4246_p3 }
  0x20   : > { %5015 = sst [smem:[#allocation37_spill]] %s5014_s23 }
  0x21   : > { %p4254_p5 = pnand %p3315_p4, %p4967_p1  ;;  %s3597_s29 = scalar_lea.hbm %s5017_s28, 32 }
  0x22   : > { %p3598_p6 = scmp.ne.s32.totalorder %s5017_s28, %s3597_s29  ;;  %p3604_p10 = scmp.lt.u32.totalorder %s3597_s29, %s5017_s28 }
  0x23   : > { %s5016_s3 = scalar_select %p4254_p5, 1, 0 }
  0x24   : > { %p4266_p7 = pneg %p4254_p5 }
  0x26   : > { %s5018_s24 = scalar_select %p4266_p7, 1, 0 }
  0x27   : > { %p3600_p8 = pnand %p4266_p7, %p3598_p6 }
  0x29   : > { %p3601_p9 = pneg %p3600_p8 }
  0x2b   : > { %p3606_p11 = pnand %p3604_p10, %p3601_p9 }
  0x2d   : > { %3609 = shalt.err (!%p3606_p11)
}
  0x2e   : > { %s3610_s26 = scalar_lea.vmem %s554_s25, 32  ;;  %p3618_p2 = scmp.lt.s32.totalorder %s554_s25, %s554_s25 }
  0x2f   : > { %p3611_p12 = scmp.ne.s32.totalorder %s554_s25, %s3610_s26  ;;  %p3619_p4 = scmp.lt.s32.totalorder %s3610_s26, %s3610_s26 }
  0x31   : > { %p3613_p13 = pnand %p3611_p12, %p4266_p7  ;;  %p3620_p1 = por %p3619_p4, %p3618_p2 }
  0x33   : > { %p3614_p0 = pneg %p3613_p13 }
  0x35   : > { %p3621_p3 = pnand %p3620_p1, %p3614_p0 }
  0x37   : > { %3624 = shalt.err (!%p3621_p3)
}
  0x38   : > { %3318 = dma.hbm_to_vmem [thread:$0]  (!%p4254_p5), %s5017_s28, 32, %s554_s25, [#allocation5]  }
  0x39   : > { %s45_s4 = sadd.s32 1, %s4067_s1  ;;  %s385_s18 = sadd.s32 1, %s4059_s20 }
  0x3a   : > { %p46_p1 = scmp.ge.s32.totalorder %s45_s4, 2  ;;  %p392_p3 = scmp.ne.s32.totalorder %s4059_s20, %s4055_s30 }
  0x3b   : > { %p393_p6 = scmp.eq.s32.totalorder %s4071_s22, 0  ;;  %p398_p9 = scmp.ne.s32.totalorder %s4055_s30, %s4051_s0 }
  0x3c   : > { %s5082_s4 = smov (%p46_p1, %s45_s4), 0  ;;  %p3366_p10 = scmp.lt.s32.totalorder %s4071_s22, 2 }
  0x3d   : > { %5019 = sst [smem:[#allocation38_spill]] %s5082_s4  ;;  %p394_p8 = por %p393_p6, %p392_p3 }
  0x3e   : > { %s382_s27 = ssub.s32 %s4067_s1, %s5082_s4  ;;  %p5020_p12 = scmp.eq.s32.totalorder %s4241_s2, 0 }
  0x3f   : > { %p383_p11 = scmp.eq.s32.totalorder %s382_s27, 0  ;;  %s677_s25 = sand.u32 1, %s4071_s22  }
  0x40   : > { %p4296_p13 = por %p5020_p12, %p398_p9  ;;  %s4973_s26 = sand.u32 1, %s4059_s20  }
  0x41   : > { %s4303_s13 = scalar_select %p383_p11, %s4059_s20, %s385_s18  }
  0x42   : > { %s5021_s29 = scalar_select %p4296_p13, 1, 0 }
  0x43   : > { %5023 = sst [smem:[#allocation40_spill]] %s4303_s13  ;;  %s3254_s19 = smul.u32 192, %s4973_s26 }
  0x44   : > { %5022 = sst [smem:[#allocation39_spill]] %s5021_s29  ;;  %s3255_s28 = smul.u32 3072, %s4067_s1 }
  0x45   : > { %p4308_p0 = pnand %p3366_p10, %p394_p8  ;;  %s5025_s15 = sld [smem:[#allocation51_spill]] }
  0x46   : > { %s681_s22 = scalar_lea.vmem [#allocation21], %s3254_s19  ;;  %s4319_s26 = scalar_lea.sflag [#allocation5], %s677_s25 }
  0x47   : > { %s5024_s21 = scalar_select %p4308_p0, 1, 0 }
  0x48   : > { %s688_s18 = sshll.u32 %s681_s22, 4  ;;  %p4325_p4 = pneg %p4308_p0  ;;  %s4317_s18 = int_to_ptr.vmem [resolvable:$true] %s688_s18 }
  0x4a   : > { %s5026_s29 = scalar_select %p4325_p4, 1, 0 }
  0x4b   : > { %s4315_s27 = scalar_lea.hbm %s5025_s15, %s3255_s28  ;;  %s3630_s19 = scalar_lea.hbm %s5025_s15, 6144 }
  0x4c   : > { %s3625_s13 = scalar_lea.hbm %s4315_s27, 3072  ;;  %p3631_p6 = scmp.lt.u32.totalorder %s4315_s27, %s5025_s15 }
  0x4d   : > { %p3626_p2 = scmp.ne.s32.totalorder %s4315_s27, %s3625_s13  ;;  %p3632_p8 = scmp.lt.u32.totalorder %s3630_s19, %s3625_s13 }
  0x4e   : > { %p3634_p10 = scmp.lt.u32.totalorder %s3625_s13, %s4315_s27 }
  0x4f   : > { %p3628_p1 = pnand %p4325_p4, %p3626_p2  ;;  %p3633_p9 = por %p3632_p8, %p3631_p6 }
  0x51   : > { %p3629_p3 = pneg %p3628_p1  ;;  %p3635_p11 = por %p3634_p10, %p3633_p9 }
  0x53   : > { %p3636_p12 = pnand %p3635_p11, %p3629_p3 }
  0x55   : > { %3639 = shalt.err (!%p3636_p12)
}
  0x56   : > { %s3640_s25 = scalar_lea.vmem %s4317_s18, 3072  ;;  %s4074_s28 = smov [#allocation21]  }
  0x57   : > { %p3641_p2 = scmp.ne.s32.totalorder %s4317_s18, %s3640_s25  ;;  %s3645_s4 = sshll.u32 %s4074_s28, 4  ;;  %s3646_s4 = int_to_ptr.vmem [resolvable:$false] %s3645_s4 }
  0x58   : > { %s3647_s22 = scalar_lea.vmem %s3646_s4, 6144  ;;  %p3648_p5 = scmp.lt.s32.totalorder %s4317_s18, %s3646_s4 }
  0x59   : > { %p3643_p1 = pnand %p3641_p2, %p4325_p4  ;;  %p3649_p7 = scmp.lt.s32.totalorder %s3647_s22, %s3640_s25 }
  0x5b   : > { %p3644_p13 = pneg %p3643_p1  ;;  %p3650_p6 = por %p3649_p7, %p3648_p5 }
  0x5d   : > { %p3651_p8 = pnand %p3650_p6, %p3644_p13 }
  0x5f   : > { %3654 = shalt.err (!%p3651_p8)
}
  0x60   : > { %s4075_s13 = smov 192   ;;  %s4076_s19 = smov 12  }
  0x61   : > { %3349 = dma.hbm_to_vmem [thread:$0]  (!%p4308_p0), %s4315_s27, 3072, %s4317_s18, %s4319_s26, %s4075_s13, %s4075_s13, %s4076_s19  }
  0x62   : > { %s4077_s0 = smov [#allocation7]   ;;  %s5027_s5 = sld [smem:[#allocation46_spill]] }
  0x63   : > { %s566_s15 = sshll.u32 %s4077_s0, 4  ;;  %p5028_p7 = scmp.ne.s32.totalorder %s5018_s24, 0  ;;  %s567_s15 = int_to_ptr.vmem [resolvable:$true] %s566_s15 }
  0x68   : > { %s3655_s4 = scalar_lea.hbm %s5027_s5, 2048 }
  0x69   : > { %p3656_p5 = scmp.ne.s32.totalorder %s5027_s5, %s3655_s4  ;;  %p3662_p9 = scmp.lt.u32.totalorder %s3655_s4, %s5027_s5 }
  0x6b   : > { %p3658_p13 = pnand %p3656_p5, %p5028_p7 }
  0x6d   : > { %p3659_p3 = pneg %p3658_p13 }
  0x6f   : > { %p3664_p10 = pnand %p3662_p9, %p3659_p3 }
  0x71   : > { %3667 = shalt.err (!%p3664_p10)
}
  0x72   : > { %s3668_s27 = scalar_lea.vmem %s567_s15, 2048  ;;  %p3676_p1 = scmp.lt.s32.totalorder %s567_s15, %s567_s15 }
  0x73   : > { %p3669_p11 = scmp.ne.s32.totalorder %s567_s15, %s3668_s27  ;;  %p3677_p6 = scmp.lt.s32.totalorder %s3668_s27, %s3668_s27 }
  0x75   : > { %p3671_p12 = pnand %p3669_p11, %p5028_p7  ;;  %p3678_p8 = por %p3677_p6, %p3676_p1 }
  0x77   : > { %p3672_p2 = pneg %p3671_p12 }
  0x79   : > { %p3679_p0 = pnand %p3678_p8, %p3672_p2 }
  0x7b   : > { %3682 = shalt.err (!%p3679_p0)
}
  0x7c   : > { %s4991_s30 = smov 64   ;;  %s4996_s18 = smov 4  }
  0x7d   : > { %p5029_p5 = scmp.ne.s32.totalorder %s5016_s3, 0  ;;  %s4080_s13 = smov [#allocation10]  }
  0x7e   : > { %s590_s19 = sshll.u32 %s4080_s13, 4  ;;  %s4081_s0 = smov [#allocation13]   ;;  %s591_s19 = int_to_ptr.vmem [resolvable:$true] %s590_s19 }
  0x7f   : > { %3321 = dma.hbm_to_vmem [thread:$0]  (!%p5029_p5), %s5027_s5, 2048, %s567_s15, [#allocation8], %s4991_s30, %s4991_s30, %s4996_s18  }
  0x80   : > { %s614_s28 = sshll.u32 %s4081_s0, 4  ;;  %s5030_s7 = sld [smem:[#allocation48_spill]]  ;;  %s4370_s28 = int_to_ptr.vmem [resolvable:$true] %s614_s28 }
  0x86   : > { %s3683_s22 = scalar_lea.hbm %s5030_s7, 1024 }
  0x87   : > { %p3684_p0 = scmp.ne.s32.totalorder %s5030_s7, %s3683_s22  ;;  %p3690_p9 = scmp.lt.u32.totalorder %s3683_s22, %s5030_s7 }
  0x89   : > { %p3686_p13 = pnand %p3684_p0, %p5028_p7 }
  0x8b   : > { %p3687_p3 = pneg %p3686_p13 }
  0x8d   : > { %p3692_p10 = pnand %p3690_p9, %p3687_p3 }
  0x8f   : > { %3695 = shalt.err (!%p3692_p10)
}
  0x90   : > { %s3696_s23 = scalar_lea.vmem %s591_s19, 1024  ;;  %p3704_p1 = scmp.lt.s32.totalorder %s591_s19, %s591_s19 }
  0x91   : > { %p3697_p11 = scmp.ne.s32.totalorder %s591_s19, %s3696_s23  ;;  %p3705_p6 = scmp.lt.s32.totalorder %s3696_s23, %s3696_s23 }
  0x93   : > { %p3699_p12 = pnand %p3697_p11, %p5028_p7  ;;  %p3706_p8 = por %p3705_p6, %p3704_p1 }
  0x95   : > { %p3700_p2 = pneg %p3699_p12 }
  0x97   : > { %p3707_p4 = pnand %p3706_p8, %p3700_p2 }
  0x99   : > { %3710 = shalt.err (!%p3707_p4)
}
  0x9a   : > { %3327 = dma.hbm_to_vmem [thread:$0]  (!%p5029_p5), %s5030_s7, 1024, %s591_s19, [#allocation11], %s4991_s30, %s4991_s30, %s4996_s18  }
  0x9b   : > { %s3711_s25 = scalar_lea.hbm %s4950_s9, 128 }
  0x9c   : > { %p3712_p0 = scmp.ne.s32.totalorder %s4950_s9, %s3711_s25  ;;  %p3718_p3 = scmp.lt.u32.totalorder %s3711_s25, %s4950_s9 }
  0x9e   : > { %p3714_p4 = pnand %p3712_p0, %p5028_p7 }
  0xa0   : > { %p3715_p13 = pneg %p3714_p4 }
  0xa2   : > { %p3720_p9 = pnand %p3718_p3, %p3715_p13 }
  0xa4   : > { %3723 = shalt.err (!%p3720_p9)
}
  0xa5   : > { %s3724_s19 = scalar_lea.vmem %s4370_s28, 128  ;;  %p3732_p2 = scmp.lt.s32.totalorder %s4370_s28, %s4370_s28 }
  0xa6   : > { %p3725_p10 = scmp.ne.s32.totalorder %s4370_s28, %s3724_s19  ;;  %p3733_p1 = scmp.lt.s32.totalorder %s3724_s19, %s3724_s19 }
  0xa8   : > { %p3727_p11 = pnand %p3725_p10, %p5028_p7  ;;  %p3734_p6 = por %p3733_p1, %p3732_p2 }
  0xaa   : > { %p3728_p12 = pneg %p3727_p11 }
  0xac   : > { %p3735_p8 = pnand %p3734_p6, %p3728_p12 }
  0xae   : > { %3738 = shalt.err (!%p3735_p8)
}
  0xaf   : > { %3333 = dma.hbm_to_vmem [thread:$0]  (!%p5029_p5), %s4950_s9, 128, %s4370_s28, [#allocation14], %s4991_s30, %s4991_s30, %s4996_s18  }
  0xb0   : > { %s4082_s13 = smov [#allocation16]   ;;  %s5031_s4 = sand.u32 1, %s4059_s20  }
  0xb1   : > { %s638_s0 = sshll.u32 %s4082_s13, 4  ;;  %s4421_s25 = sshll.u32 %s5031_s4, 6  ;;  %s639_s0 = int_to_ptr.vmem [resolvable:$true] %s638_s0 }
  0xb2   : > { %s3739_s2 = scalar_lea.hbm %s4952_s11, 2048 }
  0xb3   : > { %p3740_p0 = scmp.ne.s32.totalorder %s4952_s11, %s3739_s2  ;;  %p3746_p3 = scmp.lt.u32.totalorder %s3739_s2, %s4952_s11 }
  0xb5   : > { %p3742_p4 = pnand %p3740_p0, %p5028_p7 }
  0xb7   : > { %p3743_p13 = pneg %p3742_p4 }
  0xb9   : > { %p3748_p9 = pnand %p3746_p3, %p3743_p13 }
  0xbb   : > { %3751 = shalt.err (!%p3748_p9)
}
  0xbc   : > { %s3752_s28 = scalar_lea.vmem %s639_s0, 2048  ;;  %p3760_p2 = scmp.lt.s32.totalorder %s639_s0, %s639_s0 }
  0xbd   : > { %p3753_p10 = scmp.ne.s32.totalorder %s639_s0, %s3752_s28  ;;  %p3761_p1 = scmp.lt.s32.totalorder %s3752_s28, %s3752_s28 }
  0xbf   : > { %p3755_p11 = pnand %p3753_p10, %p5028_p7  ;;  %p3762_p6 = por %p3761_p1, %p3760_p2 }
  0xc1   : > { %p3756_p12 = pneg %p3755_p11 }
  0xc3   : > { %p3763_p8 = pnand %p3762_p6, %p3756_p12 }
  0xc5   : > { %3766 = shalt.err (!%p3763_p8)
}
  0xc6   : > { %s4083_s13 = smov 128   ;;  %s4084_s4 = smov 8  }
  0xc7   : > { %3339 = dma.hbm_to_vmem [thread:$0]  (!%p5029_p5), %s4952_s11, 2048, %s639_s0, [#allocation17], %s4083_s13, %s4083_s13, %s4084_s4  }
  0xc8   : > { %s4994_s2 = sshll.u32 %s4067_s1, 10  ;;  %s702_s14 = scalar_lea.vmem [#allocation22], %s4421_s25 }
  0xc9   : > { %s4447_s23 = scalar_lea.hbm %s4957_s16, %s4994_s2  ;;  %s709_s28 = sshll.u32 %s702_s14, 4  ;;  %s4450_s28 = int_to_ptr.vmem [resolvable:$true] %s709_s28 }
  0xca   : > { %s3767_s30 = scalar_lea.hbm %s4447_s23, 1024  ;;  %p5032_p4 = scmp.ne.s32.totalorder %s5026_s29, 0 }
  0xcb   : > { %p3768_p0 = scmp.ne.s32.totalorder %s4447_s23, %s3767_s30  ;;  %s3772_s4 = scalar_lea.hbm %s4957_s16, 2048 }
  0xcc   : > { %p3773_p9 = scmp.lt.u32.totalorder %s4447_s23, %s4957_s16  ;;  %p3774_p10 = scmp.lt.u32.totalorder %s3772_s4, %s3767_s30 }
  0xcd   : > { %p3770_p13 = pnand %p3768_p0, %p5032_p4  ;;  %p3776_p12 = scmp.lt.u32.totalorder %s3767_s30, %s4447_s23 }
  0xce   : > { %p3775_p11 = por %p3774_p10, %p3773_p9 }
  0xcf   : > { %p3771_p3 = pneg %p3770_p13 }
  0xd0   : > { %p3777_p2 = por %p3776_p12, %p3775_p11 }
  0xd2   : > { %p3778_p1 = pnand %p3777_p2, %p3771_p3 }
  0xd4   : > { %3781 = shalt.err (!%p3778_p1)
}
  0xd5   : > { %s3782_s15 = scalar_lea.vmem %s4450_s28, 1024  ;;  %s4085_s19 = smov [#allocation22]  }
  0xd6   : > { %p3783_p6 = scmp.ne.s32.totalorder %s4450_s28, %s3782_s15  ;;  %s3787_s14 = sshll.u32 %s4085_s19, 4  ;;  %s3788_s14 = int_to_ptr.vmem [resolvable:$false] %s3787_s14 }
  0xd7   : > { %s3789_s0 = scalar_lea.vmem %s3788_s14, 2048  ;;  %p3790_p13 = scmp.lt.s32.totalorder %s4450_s28, %s3788_s14 }
  0xd8   : > { %p3785_p8 = pnand %p3783_p6, %p5032_p4  ;;  %p3791_p5 = scmp.lt.s32.totalorder %s3789_s0, %s3782_s15 }
  0xda   : > { %p3786_p0 = pneg %p3785_p8  ;;  %p3792_p9 = por %p3791_p5, %p3790_p13 }
  0xdc   : > { %p3793_p10 = pnand %p3792_p9, %p3786_p0 }
  0xde   : > { %3796 = shalt.err (!%p3793_p10)
}
  0xdf   : > { %p5033_p3 = scmp.ne.s32.totalorder %s5024_s21, 0  ;;  %s5034_s30 = smov 64  }
  0xe0   : > { %s4086_s13 = smov [#allocation9]   ;;  %s4087_s22 = smov [#allocation12]  }
  0xe1   : > { %3352 = dma.hbm_to_vmem [thread:$0]  (!%p5033_p3), %s4447_s23, 1024, %s4450_s28, %s4319_s26, %s5034_s30, %s5034_s30, %s4996_s18  }
  0xe2   : > { %s580_s4 = sshll.u32 %s4086_s13, 4  ;;  %s604_s27 = sshll.u32 %s4087_s22, 4  ;;  %s581_s4 = int_to_ptr.vmem [resolvable:$true] %s580_s4  ;;  %s605_s27 = int_to_ptr.vmem [resolvable:$true] %s604_s27 }
  0xe3   : > { %s5035_s6 = sld [smem:[#allocation47_spill]] }
  0xe9   : > { %s3797_s14 = scalar_lea.hbm %s5035_s6, 16 }
  0xea   : > { %p3798_p5 = scmp.ne.s32.totalorder %s5035_s6, %s3797_s14  ;;  %p3804_p2 = scmp.lt.u32.totalorder %s3797_s14, %s5035_s6 }
  0xec   : > { %p3800_p11 = pnand %p3798_p5, %p5028_p7 }
  0xee   : > { %p3801_p12 = pneg %p3800_p11 }
  0xf0   : > { %p3806_p1 = pnand %p3804_p2, %p3801_p12 }
  0xf2   : > { %3809 = shalt.err (!%p3806_p1)
}
  0xf3   : > { %s3810_s23 = scalar_lea.vmem %s581_s4, 16  ;;  %s3817_s28 = scalar_lea.vmem %s581_s4, 32 }
  0xf4   : > { %p3811_p6 = scmp.ne.s32.totalorder %s581_s4, %s3810_s23  ;;  %p3818_p13 = scmp.lt.s32.totalorder %s581_s4, %s581_s4 }
  0xf5   : > { %p3819_p9 = scmp.lt.s32.totalorder %s3817_s28, %s3810_s23 }
  0xf6   : > { %p3813_p8 = pnand %p3811_p6, %p5028_p7 }
  0xf7   : > { %p3820_p10 = por %p3819_p9, %p3818_p13 }
  0xf8   : > { %p3814_p0 = pneg %p3813_p8 }
  0xfa   : > { %p3821_p3 = pnand %p3820_p10, %p3814_p0 }
  0xfc   : > { %3824 = shalt.err (!%p3821_p3)
}
  0xfd   : > { %p5036_p5 = scmp.ne.s32.totalorder %s5016_s3, 0  ;;  %s3825_s22 = scalar_lea.hbm %s4949_s8, 16 }
  0xfe   : > { %p3826_p11 = scmp.ne.s32.totalorder %s4949_s8, %s3825_s22  ;;  %p3832_p3 = scmp.lt.u32.totalorder %s3825_s22, %s4949_s8 }
  0xff   : > { %3324 = dma.hbm_to_vmem [thread:$0]  (!%p5036_p5), %s5035_s6, 16, %s581_s4, [#allocation8]  }
 0x100   : > { %p3828_p12 = pnand %p3826_p11, %p5028_p7 }
 0x102   : > { %p3829_p2 = pneg %p3828_p12 }
 0x104   : > { %p3834_p1 = pnand %p3832_p3, %p3829_p2 }
 0x106   : > { %3837 = shalt.err (!%p3834_p1)
}
 0x107   : > { %s3838_s23 = scalar_lea.vmem %s605_s27, 16  ;;  %s3845_s4 = scalar_lea.vmem %s605_s27, 32 }
 0x108   : > { %p3839_p6 = scmp.ne.s32.totalorder %s605_s27, %s3838_s23  ;;  %p3846_p13 = scmp.lt.s32.totalorder %s605_s27, %s605_s27 }
 0x109   : > { %p3847_p9 = scmp.lt.s32.totalorder %s3845_s4, %s3838_s23 }
 0x10a   : > { %p3841_p8 = pnand %p3839_p6, %p5028_p7 }
 0x10b   : > { %p3848_p10 = por %p3847_p9, %p3846_p13 }
 0x10c   : > { %p3842_p0 = pneg %p3841_p8 }
 0x10e   : > { %p3849_p4 = pnand %p3848_p10, %p3842_p0 }
 0x110   : > { %3852 = shalt.err (!%p3849_p4)
}
 0x111   : > { %3330 = dma.hbm_to_vmem [thread:$0]  (!%p5036_p5), %s4949_s8, 16, %s605_s27, [#allocation11]  }
 0x112   : > { %s4088_s13 = smov [#allocation15]   ;;  %s4089_s7 = smov [#allocation18]  }
 0x113   : > { %s628_s5 = sshll.u32 %s4088_s13, 4  ;;  %s652_s22 = sshll.u32 %s4089_s7, 4  ;;  %s629_s5 = int_to_ptr.vmem [resolvable:$true] %s628_s5  ;;  %s653_s22 = int_to_ptr.vmem [resolvable:$true] %s652_s22 }
 0x114   : > { %s3853_s14 = scalar_lea.hbm %s4951_s10, 16 }
 0x115   : > { %p3854_p4 = scmp.ne.s32.totalorder %s4951_s10, %s3853_s14  ;;  %p3860_p2 = scmp.lt.u32.totalorder %s3853_s14, %s4951_s10 }
 0x117   : > { %p3856_p11 = pnand %p3854_p4, %p5028_p7 }
 0x119   : > { %p3857_p12 = pneg %p3856_p11 }
 0x11b   : > { %p3862_p3 = pnand %p3860_p2, %p3857_p12 }
 0x11d   : > { %3865 = shalt.err (!%p3862_p3)
}
 0x11e   : > { %s3866_s27 = scalar_lea.vmem %s629_s5, 16  ;;  %s3873_s2 = scalar_lea.vmem %s629_s5, 32 }
 0x11f   : > { %p3867_p1 = scmp.ne.s32.totalorder %s629_s5, %s3866_s27  ;;  %p3874_p0 = scmp.lt.s32.totalorder %s629_s5, %s629_s5 }
 0x120   : > { %p3875_p13 = scmp.lt.s32.totalorder %s3873_s2, %s3866_s27 }
 0x121   : > { %p3869_p6 = pnand %p3867_p1, %p5028_p7 }
 0x122   : > { %p3876_p9 = por %p3875_p13, %p3874_p0 }
 0x123   : > { %p3870_p8 = pneg %p3869_p6 }
 0x125   : > { %p3877_p10 = pnand %p3876_p9, %p3870_p8 }
 0x127   : > { %3880 = shalt.err (!%p3877_p10)
}
 0x128   : > { %3336 = dma.hbm_to_vmem [thread:$0]  (!%p5036_p5), %s4951_s10, 16, %s629_s5, [#allocation14]  }
 0x129   : > { %s3881_s14 = scalar_lea.hbm %s4953_s12, 32 }
 0x12a   : > { %p3882_p4 = scmp.ne.s32.totalorder %s4953_s12, %s3881_s14  ;;  %p3888_p2 = scmp.lt.u32.totalorder %s3881_s14, %s4953_s12 }
 0x12c   : > { %p3884_p11 = pnand %p3882_p4, %p5028_p7 }
 0x12e   : > { %p3885_p12 = pneg %p3884_p11 }
 0x130   : > { %p3890_p3 = pnand %p3888_p2, %p3885_p12 }
 0x132   : > { %3893 = shalt.err (!%p3890_p3)
}
 0x133   : > { %s3894_s27 = scalar_lea.vmem %s653_s22, 32  ;;  %p3902_p0 = scmp.lt.s32.totalorder %s653_s22, %s653_s22 }
 0x134   : > { %p3895_p1 = scmp.ne.s32.totalorder %s653_s22, %s3894_s27  ;;  %p3903_p13 = scmp.lt.s32.totalorder %s3894_s27, %s3894_s27 }
 0x136   : > { %p3897_p6 = pnand %p3895_p1, %p5028_p7  ;;  %p3904_p9 = por %p3903_p13, %p3902_p0 }
 0x138   : > { %p3898_p8 = pneg %p3897_p6 }
 0x13a   : > { %p3905_p10 = pnand %p3904_p9, %p3898_p8 }
 0x13c   : > { %3908 = shalt.err (!%p3905_p10)
}
 0x13d   : > { %3342 = dma.hbm_to_vmem [thread:$0]  (!%p5036_p5), %s4953_s12, 32, %s653_s22, [#allocation17]  }
 0x13e   : > { %s4090_s13 = smov [#allocation19]   ;;  %s5037_s19 = sshll.u32 %s4067_s1, 10 }
 0x13f   : > { %s666_s7 = sshll.u32 %s4090_s13, 4  ;;  %s4554_s0 = scalar_lea.hbm %s4958_s17, %s5037_s19  ;;  %s667_s7 = int_to_ptr.vmem [resolvable:$true] %s666_s7 }
 0x140   : > { %s5038_s28 = sld [smem:[#allocation50_spill]] }
 0x146   : > { %s3909_s27 = scalar_lea.hbm %s5038_s28, 16 }
 0x147   : > { %p3910_p4 = scmp.ne.s32.totalorder %s5038_s28, %s3909_s27  ;;  %p3916_p2 = scmp.lt.u32.totalorder %s3909_s27, %s5038_s28 }
 0x149   : > { %p3912_p11 = pnand %p3910_p4, %p5028_p7 }
 0x14b   : > { %p3913_p12 = pneg %p3912_p11 }
 0x14d   : > { %p3918_p3 = pnand %p3916_p2, %p3913_p12 }
 0x14f   : > { %3921 = shalt.err (!%p3918_p3)
}
 0x150   : > { %s3922_s2 = scalar_lea.vmem %s667_s7, 16  ;;  %s3929_s13 = scalar_lea.vmem %s667_s7, 32 }
 0x151   : > { %p3923_p1 = scmp.ne.s32.totalorder %s667_s7, %s3922_s2  ;;  %p3930_p0 = scmp.lt.s32.totalorder %s667_s7, %s667_s7 }
 0x152   : > { %p3931_p13 = scmp.lt.s32.totalorder %s3929_s13, %s3922_s2 }
 0x153   : > { %p3925_p6 = pnand %p3923_p1, %p5028_p7 }
 0x154   : > { %p3932_p9 = por %p3931_p13, %p3930_p0 }
 0x155   : > { %p3926_p8 = pneg %p3925_p6 }
 0x157   : > { %p3933_p10 = pnand %p3932_p9, %p3926_p8 }
 0x159   : > { %3936 = shalt.err (!%p3933_p10)
}
 0x15a   : > { %3345 = dma.hbm_to_vmem [thread:$0]  (!%p5036_p5), %s5038_s28, 16, %s667_s7, [#allocation20]  }
 0x15b   : > { %s723_s24 = scalar_lea.vmem [#allocation23], %s4421_s25  ;;  %s3937_s15 = scalar_lea.hbm %s4554_s0, 1024 }
 0x15c   : > { %s730_s19 = sshll.u32 %s723_s24, 4  ;;  %p3938_p7 = scmp.ne.s32.totalorder %s4554_s0, %s3937_s15  ;;  %s4575_s19 = int_to_ptr.vmem [resolvable:$true] %s730_s19 }
 0x15d   : > { %p5039_p4 = scmp.ne.s32.totalorder %s5026_s29, 0  ;;  %s3942_s23 = scalar_lea.hbm %s4958_s17, 2048 }
 0x15e   : > { %p3943_p2 = scmp.lt.u32.totalorder %s4554_s0, %s4958_s17  ;;  %p3944_p3 = scmp.lt.u32.totalorder %s3942_s23, %s3937_s15 }
 0x15f   : > { %p3940_p11 = pnand %p3938_p7, %p5039_p4  ;;  %p3946_p5 = scmp.lt.u32.totalorder %s3937_s15, %s4554_s0 }
 0x160   : > { %p3945_p1 = por %p3944_p3, %p3943_p2 }
 0x161   : > { %p3941_p12 = pneg %p3940_p11 }
 0x162   : > { %p3947_p6 = por %p3946_p5, %p3945_p1 }
 0x164   : > { %p3948_p8 = pnand %p3947_p6, %p3941_p12 }
 0x166   : > { %3951 = shalt.err (!%p3948_p8)
}
 0x167   : > { %s3952_s25 = scalar_lea.vmem %s4575_s19, 1024  ;;  %s4091_s7 = smov [#allocation23]  }
 0x168   : > { %p3953_p0 = scmp.ne.s32.totalorder %s4575_s19, %s3952_s25  ;;  %s3957_s22 = sshll.u32 %s4091_s7, 4  ;;  %s3958_s22 = int_to_ptr.vmem [resolvable:$false] %s3957_s22 }
 0x169   : > { %s3959_s5 = scalar_lea.vmem %s3958_s22, 2048  ;;  %p3960_p10 = scmp.lt.s32.totalorder %s4575_s19, %s3958_s22 }
 0x16a   : > { %p3955_p13 = pnand %p3953_p0, %p5039_p4  ;;  %p3961_p7 = scmp.lt.s32.totalorder %s3959_s5, %s3952_s25 }
 0x16c   : > { %p3956_p9 = pneg %p3955_p13  ;;  %p3962_p11 = por %p3961_p7, %p3960_p10 }
 0x16e   : > { %p3963_p2 = pnand %p3962_p11, %p3956_p9 }
 0x170   : > { %3966 = shalt.err (!%p3963_p2)
}
 0x171   : > { %p5040_p12 = scmp.ne.s32.totalorder %s5024_s21, 0  ;;  %s5041_s2 = smov 4  }
 0x172   : > { %s5042_s29 = sld [smem:[#allocation37_spill]] }
 0x173   : > { %3355 = dma.hbm_to_vmem [thread:$0]  (!%p5040_p12), %s4554_s0, 1024, %s4575_s19, %s4319_s26, %s5034_s30, %s5034_s30, %s5041_s2  }
 0x178   : > { %p5043_p4 = scmp.ne.s32.totalorder %s5042_s29, 0 }
 0x179   : > { %s5044_s13 = sld [smem:[#allocation36_spill]] (!%p5043_p4) }
 0x17a   : > { %749 = sbr.rel (%p5043_p4) target bundleno = 2494 (0x9be), region = 96 }
 0x17f   : > { %p5045_p3 = scmp.eq.s32.totalorder (!%p5043_p4), %s5044_s13, 0 }
 0x181   : > { %4018 = dma.done.wait (%p5045_p3), [#allocation5], 32   ;;  %p5046_p1 = pmov %p5045_p3 }
 0x183   : > { %4020 = vsyncadd (%p5046_p1), [#allocation5], 4294967264  ;;  %p5047_p5 = pmov %p5046_p1 }
 0x184   : > { %p5048_p6 = pmov %p5046_p1 }
 0x185   : > { %4022 = dma.done.wait (%p5047_p5), [#allocation8], 2064  }
 0x186   : > { %4024 = vsyncadd (%p5048_p6), [#allocation8], 4294965232  ;;  %p5049_p8 = pmov %p5046_p1 }
 0x187   : > { %p5050_p0 = pmov %p5046_p1 }
 0x188   : > { %4026 = dma.done.wait (%p5049_p8), [#allocation11], 1040  }
 0x189   : > { %4028 = vsyncadd (%p5050_p0), [#allocation11], 4294966256  ;;  %p5051_p13 = pmov %p5050_p0 }
 0x18a   : > { %p5052_p9 = pmov %p5050_p0 }
 0x18b   : > { %4030 = dma.done.wait (%p5051_p13), [#allocation14], 144  }
 0x18c   : > { %4032 = vsyncadd (%p5052_p9), [#allocation14], 4294967152  ;;  %p5053_p10 = pmov %p5050_p0 }
 0x18d   : > { %p5054_p7 = pmov %p5050_p0 }
 0x18e   : > { %4034 = dma.done.wait (%p5053_p10), [#allocation17], 2080  }
 0x18f   : > { %4036 = vsyncadd (%p5054_p7), [#allocation17], 4294965216  ;;  %p5055_p11 = pmov %p5050_p0 }
 0x190   : > { %p5056_p2 = pmov %p5050_p0 }
 0x191   : > { %4038 = dma.done.wait (%p5055_p11), [#allocation20], 16  }
 0x192   : > { %4040 = vsyncadd (%p5056_p2), [#allocation20], 4294967280  ;;  %s5057_s21 = sld [smem:[#allocation33_spill]]  ;;  %s5058_s26 = sld [smem:[#allocation39_spill]] }
 0x193   : > { %s791_s30 = sand.u32 1, %s5044_s13  }
 0x194   : > { %s792_s18 = scalar_lea.sflag [#allocation5], %s791_s30 }
 0x198   : > { %s793_s0 = sand.u32 1, %s5057_s21   ;;  %p5059_p12 = scmp.ne.s32.totalorder %s5058_s26, 0 }
 0x199   : > { %s3256_s6 = smul.u32 192, %s793_s0 }
 0x19b   : > { %s4630_s24 = scalar_lea.vmem [#allocation21], %s3256_s6 }
 0x19c   : > { %4042 = dma.done.wait (%p5059_p12), %s792_s18, 5120  }
 0x19d   : > { %4044 = vsyncadd (%p5059_p12), %s792_s18, 4294962176  ;;  %s5060_s19 = sld [smem:[#allocation34_spill]]  ;;  %s2940_s15 = sshll.u32 %s793_s0, 6 }
 0x19e   : > { %s5061_s27 = sld [smem:[#allocation52_spill]]  ;;  %s4643_s7 = scalar_lea.vmem [#allocation22], %s2940_s15 }
 0x19f   : > { %s4645_s22 = scalar_lea.vmem [#allocation23], %s2940_s15 }
 0x1a3   : > { %p910_p4 = scmp.lt.s32.totalorder %s5060_s19, 1  ;;  %p2943_p3 = scmp.ne.s32.totalorder %s5060_s19, 0 }
 0x1a4   : > { %s5062_s29 = sld [smem:[#allocation41_spill]] (!%p2943_p3)  ;;  %v4092_v1 = vmov (!%p2943_p3), 0   ;;  %v3462_v3 = vld [vmem:[#allocation7 + $0x40] sm:$0xff] (!%p2943_p3)   ;;  %v3464_v5 = vld [vmem:[#allocation7 + $0x48] sm:$0xff] (!%p2943_p3)   ;;  %v3466_v7 = vld [vmem:[#allocation7 + $0x50] sm:$0xff] (!%p2943_p3)   ;;  %v920_v19 = vlaneseq (!%p2943_p3)  ;;  %v4093_v22 = vmov (!%p2943_p3), 0.0  }
 0x1a5   : > { %s911_s3 = scalar_select %p910_p4, %s5060_s19, 1 }
 0x1a6   : > { %919 = sbr.rel (%p2943_p3) target bundleno = 1140 (0x474), region = 152  ;;  %3461 = vset.pattern.permute.xlu0 (!%p2943_p3), %v4092_v1  ;;  %v3463_v4 = vld [vmem:[#allocation7] sm:$0xff] (!%p2943_p3)   ;;  %3063 = vmatprep.subr.bf16.mxu0 (!%p2943_p3), %v3462_v3  ;;  %v3465_v6 = vld [vmem:[#allocation7 + $0x8] sm:$0xff] (!%p2943_p3)   ;;  %v3467_v8 = vld [vmem:[#allocation7 + $0x10] sm:$0xff] (!%p2943_p3)   ;;  %v921_v21 = vand.u32 (!%p2943_p3), 127, %v920_v19  ;;  %s5063_s0 = sld [smem:[#allocation42_spill]] (!%p2943_p3) }
 0x1a7   : > { %s2942_s14 = sshll.u32 %s911_s3, 3  ;;  %3064 = vmatpush3.bf16.msra.mxu0 (!%p2943_p3), %v3463_v4  ;;  %v3468_v9 = vld [vmem:[#allocation7 + $0x58] sm:$0xff] (!%p2943_p3)   ;;  %v3470_v11 = vld [vmem:[#allocation7 + $0x60] sm:$0xff] (!%p2943_p3)   ;;  %v3472_v13 = vld [vmem:[#allocation7 + $0x68] sm:$0xff] (!%p2943_p3)   ;;  %3134 = vmatprep.subr.bf16.mxu1 (!%p2943_p3), %v4093_v22  ;;  %v4094_v47 = vmov (!%p2943_p3), 683565275  }
 0x1a8   : > { %s4641_s25 = scalar_lea.vmem %s5061_s27, %s2942_s14  ;;  %3065 = vmatprep.subr.bf16.mxu0 (!%p2943_p3), %v3464_v5  ;;  %v3469_v10 = vld [vmem:[#allocation7 + $0x18] sm:$0xff] (!%p2943_p3)   ;;  %v3471_v12 = vld [vmem:[#allocation7 + $0x20] sm:$0xff] (!%p2943_p3)   ;;  %v3473_v14 = vld [vmem:[#allocation7 + $0x28] sm:$0xff] (!%p2943_p3)   ;;  %v922_v23 = vcvt.s32.f32 (!%p2943_p3), %v921_v21  ;;  %v4095_v51 = vmov (!%p2943_p3), 2475754826   ;;  %s5065_s14 = sld [smem:[#allocation43_spill]] (!%p2943_p3) }
 0x1a9   : > { %v3474_v15 = vld [vmem:[#allocation7 + $0x70] sm:$0xff] (!%p2943_p3)   ;;  %v3476_v17 = vld [vmem:[#allocation7 + $0x78] sm:$0xff] (!%p2943_p3)   ;;  %v3478_v20 = vld [vmem:[#allocation10] sm:$0xff] (!%p2943_p3)   ;;  %v4096_v53 = vmov (!%p2943_p3), 2131351028   ;;  %s5066_s2 = sld [smem:[#allocation45_spill]] (!%p2943_p3) }
 0x1aa   : > { %v926_v0 = vld [vmem:[%s5062_s29] sm:$0xff] (!%p2943_p3)  ;;  %v927_v2 = vld [vmem:[%s5062_s29 + $0x8] sm:$0xff] (!%p2943_p3)  ;;  %3135 = vmatpush3.bf16.msra.mxu1 (!%p2943_p3), %v3478_v20  ;;  %v923_v24 = vmul.f32 (!%p2943_p3), -0.071955785, %v922_v23  ;;  %v4097_v55 = vmov (!%p2943_p3), 2102212464  }
 0x1ab   : > { %930 = vperm.xlu0 (!%p2943_p3), %3461, %v926_v0   ;;  %3066 = vmatpush3.bf16.msra.mxu0 (!%p2943_p3), %v3465_v6  ;;  %v3475_v16 = vld [vmem:[#allocation7 + $0x30] sm:$0xff] (!%p2943_p3)   ;;  %v3477_v18 = vld [vmem:[#allocation7 + $0x38] sm:$0xff] (!%p2943_p3)   ;;  %v4098_v57 = vmov (!%p2943_p3), 920167782   ;;  %v4099_v0 = vmov (!%p2943_p3), 1326507024  }
 0x1ac   : > { %3067 = vmatprep.subr.bf16.mxu0 (!%p2943_p3), %v3466_v7  ;;  %3136 = vmatprep.subr.bf16.mxu1 (!%p2943_p3), %v4093_v22  ;;  %v924_v25 = vmul.f32 (!%p2943_p3), 1.442695, %v923_v24  ;;  %s5064_s6 = smov (!%p2943_p3), %s5063_s0 }
 0x1ae   : > { %3487 = vpow2.f32 %v924_v25 }
 0x1af   : > { %935 = vperm.xlu0 %3461, %v927_v2   ;;  %3068 = vmatpush3.bf16.msra.mxu0 %v3467_v8 }
 0x1b0   : > { %3069 = vmatprep.subr.bf16.mxu0 %v3468_v9 }
 0x1b3   : > { %3070 = vmatpush3.bf16.msra.mxu0 %v3469_v10 }
 0x1b4   : > { %3071 = vmatprep.subr.bf16.mxu0 %v3470_v11 }
 0x1b7   : > { %3072 = vmatpush3.bf16.msra.mxu0 %v3471_v12 }
 0x1b8   : > { %3073 = vmatprep.subr.bf16.mxu0 %v3472_v13  ;;  %v3488_v26 = vpop.eup %3487 }
 0x1bb   : > { %3074 = vmatpush3.bf16.msra.mxu0 %v3473_v14 }
 0x1bc   : > { %3075 = vmatprep.subr.bf16.mxu0 %v3474_v15 }
 0x1bf   : > { %3076 = vmatpush3.bf16.msra.mxu0 %v3475_v16 }
 0x1c0   : > { %3077 = vmatprep.subr.bf16.mxu0 %v3476_v17 }
 0x1c3   : > { %3078 = vmatpush3.bf16.msra.mxu0 %v3477_v18 }
 0x1c4   : > { %3160 = vmatprep.subr.bf16.mxu0 %v4093_v22 }
 0x22a   : > { %v931_v27 = vpop.permute.xlu0 %930 }
 0x22b   : > { %v4657_v28 = vmul.f32 %v3488_v26, %v931_v27 }
 0x22d   : > { %v940_v29 = vand.u32 2147483647, %v4657_v28  ;;  %v943_v30 = vand.u32 2139095040, %v4657_v28  ;;  %vm942_vm14 = vcmp.lt.s32.totalorder %v4657_v28, 0 }
 0x22e   : > { %v936_v31 = vpop.permute.xlu0 %935 }
 0x22f   : > { %v944_v32 = vshrl.u32 %v943_v30, 23  ;;  %v4661_v33 = vmul.f32 %v3488_v26, %v936_v31  ;;  %v947_v34 = vand.u32 8388607, %v940_v29  ;;  %vm941_vm15 = vcmp.le.f32.partialorder %v940_v29, 0.7853982 }
 0x231   : > { %v2944_v35 = vadd.s32 4294967169, %v944_v32  ;;  %v1046_v36 = vand.u32 2139095040, %v4661_v33  ;;  %v948_v38 = vor.u32 8388608, %v947_v34  ;;  %v1043_v40 = vand.u32 2147483647, %v4661_v33 }
 0x233   : > { %v950_v37 = vadd.s32 1, %v2944_v35  ;;  %v1047_v39 = vshrl.u32 %v1046_v36, 23  ;;  %v4667_v45 = vshll.u32 %v948_v38, 8  ;;  %v1050_v49 = vand.u32 8388607, %v1043_v40 }
 0x235   : > { %vm951_vm0 = vcmp.gt.s32.totalorder %v950_v37, 0  ;;  %v2948_v42 = vadd.s32 4294967169, %v1047_v39  ;;  %v1051_v15 = vor.u32 8388608, %v1050_v49 }
 0x236   : > { %v952_v41 = vsel %vm951_vm0, %v950_v37, 0  ;;  %vm1045_vm0 = vcmp.lt.s32.totalorder %v4661_v33, 0 }
 0x237   : > { %v953_v43 = vshrl.u32 %v952_v41, 5  ;;  %v954_v44 = vand.u32 31, %v952_v41  ;;  %v1053_v50 = vadd.s32 1, %v2948_v42  ;;  %v1091_v31 = vshll.u32 %v1051_v15, 8 }
 0x239   : > { %v955_v46 = vsub.s32 32, %v954_v44  ;;  %v957_v48 = vshll.u32 %v4094_v47, %v954_v44  ;;  %v960_v52 = vshll.u32 %v4095_v51, %v954_v44  ;;  %v963_v54 = vshll.u32 %v4096_v53, %v954_v44 }
 0x23a   : > { %v966_v56 = vshll.u32 %v4097_v55, %v954_v44  ;;  %v969_v58 = vshll.u32 %v4098_v57, %v954_v44  ;;  %vm972_vm1 = vcmp.lt.s32.totalorder %v953_v43, 1  ;;  %vm974_vm2 = vcmp.lt.s32.totalorder %v953_v43, 3 }
 0x23b   : > { %v958_v59 = vshrl.u32 %v4095_v51, %v955_v46  ;;  %v961_v60 = vshrl.u32 %v4096_v53, %v955_v46  ;;  %v964_v61 = vshrl.u32 %v4097_v55, %v955_v46  ;;  %v956_v62 = vshrl.u32 %v4094_v47, %v955_v46 }
 0x23c   : > { %v967_v63 = vshrl.u32 %v4098_v57, %v955_v46  ;;  %v970_v1 = vshrl.u32 %v4099_v0, %v955_v46  ;;  %vm1054_vm3 = vcmp.gt.s32.totalorder %v1053_v50, 0  ;;  %vm975_vm4 = vcmp.lt.s32.totalorder %v953_v43, 4 }
 0x23d   : > { %v959_v2 = vor.u32 %v958_v59, %v957_v48  ;;  %v962_v3 = vor.u32 %v961_v60, %v960_v52  ;;  %v965_v4 = vor.u32 %v964_v61, %v963_v54  ;;  %v1055_v7 = vsel %vm1054_vm3, %v1053_v50, 0 }
 0x23e   : > { %v968_v5 = vor.u32 %v967_v63, %v966_v56  ;;  %v971_v6 = vor.u32 %v970_v1, %v969_v58  ;;  %vm973_vm5 = vcmp.lt.s32.totalorder %v953_v43, 2  ;;  %v1057_v18 = vand.u32 31, %v1055_v7 }
 0x23f   : > { %v976_v8 = vsel %vm972_vm1, %v956_v62, %v959_v2  ;;  %v977_v9 = vsel %vm975_vm4, %v965_v4, 2102212464  ;;  %v980_v10 = vsel %vm972_vm1, %v959_v2, %v962_v3  ;;  %v984_v11 = vsel %vm972_vm1, %v962_v3, %v965_v4 }
 0x240   : > { %v978_v12 = vsel %vm974_vm2, %v962_v3, %v977_v9  ;;  %v981_v13 = vsel %vm975_vm4, %v968_v5, 920167782  ;;  %v985_v14 = vsel %vm975_vm4, %v971_v6, 1326507024  ;;  %v1056_v27 = vshrl.u32 %v1055_v7, 5 }
 0x241   : > { %v982_v16 = vsel %vm974_vm2, %v965_v4, %v981_v13  ;;  %v986_v17 = vsel %vm974_vm2, %v968_v5, %v985_v14  ;;  %v979_v19 = vsel %vm973_vm5, %v976_v8, %v978_v12  ;;  %v1058_v30 = vsub.s32 32, %v1057_v18 }
 0x242   : > { %v983_v20 = vsel %vm973_vm5, %v980_v10, %v982_v16  ;;  %v987_v21 = vsel %vm973_vm5, %v984_v11, %v986_v17  ;;  %v995_v32 = vmul.u32 %v4667_v45, %v979_v19  ;;  %v1060_v34 = vshll.u32 %v4094_v47, %v1057_v18 }
 0x243   : > { %v4680_v23 = vmul.u32.u64.low %v4667_v45, %v987_v21  ;;  %v4681_v24 = vmul.u32.u64.high %v4667_v45, %v987_v21, %v4680_v23  ;;  %v4684_v25 = vmul.u32.u64.low %v4667_v45, %v983_v20  ;;  %v4685_v26 = vmul.u32.u64.high %v4667_v45, %v983_v20, %v4684_v25 }
 0x244   : > { %v1063_v35 = vshll.u32 %v4095_v51, %v1057_v18  ;;  %v1066_v36 = vshll.u32 %v4096_v53, %v1057_v18  ;;  %v1061_v37 = vshrl.u32 %v4095_v51, %v1058_v30  ;;  %v1064_v38 = vshrl.u32 %v4096_v53, %v1058_v30 }
 0x245   : > { %v1067_v39 = vshrl.u32 %v4097_v55, %v1058_v30  ;;  %v1069_v41 = vshll.u32 %v4097_v55, %v1057_v18  ;;  %vm997_vm6 = vc.u32 %v4681_v24, %v4684_v25  ;;  %v998_v42 = vadd.s32 1, %v4685_v26 }
 0x246   : > { %v1070_v43 = vshrl.u32 %v4098_v57, %v1058_v30  ;;  %v1072_v44 = vshll.u32 %v4098_v57, %v1057_v18  ;;  %v1062_v46 = vor.u32 %v1061_v37, %v1060_v34  ;;  %v1065_v48 = vor.u32 %v1064_v38, %v1063_v35 }
 0x247   : > { %v1068_v49 = vor.u32 %v1067_v39, %v1066_v36  ;;  %v1073_v50 = vshrl.u32 %v4099_v0, %v1058_v30  ;;  %v999_v45 = vsel %vm997_vm6, %v998_v42, %v4685_v26  ;;  %vm1075_vm7 = vcmp.lt.s32.totalorder %v1056_v27, 1 }
 0x248   : > { %v1071_v52 = vor.u32 %v1070_v43, %v1069_v41  ;;  %vm1078_vm8 = vcmp.lt.s32.totalorder %v1056_v27, 4  ;;  %v1000_v51 = vadd.s32 %v999_v45, %v995_v32  ;;  %vm1077_vm9 = vcmp.lt.s32.totalorder %v1056_v27, 3 }
 0x249   : > { %v1074_v53 = vor.u32 %v1073_v50, %v1072_v44  ;;  %v1080_v54 = vsel %vm1078_vm8, %v1068_v49, 2102212464  ;;  %v1059_v55 = vshrl.u32 %v4094_v47, %v1058_v30  ;;  %v1083_v56 = vsel %vm1075_vm7, %v1062_v46, %v1065_v48 }
 0x24a   : > { %v1084_v58 = vsel %vm1078_vm8, %v1071_v52, 920167782  ;;  %v1087_v59 = vsel %vm1075_vm7, %v1065_v48, %v1068_v49  ;;  %v1001_v60 = vadd.s32 536870912, %v1000_v51  ;;  %vm1076_vm10 = vcmp.lt.s32.totalorder %v1056_v27, 2 }
 0x24b   : > { %v1085_v57 = vsel %vm1077_vm9, %v1068_v49, %v1084_v58  ;;  %v1088_v61 = vsel %vm1078_vm8, %v1074_v53, 1326507024  ;;  %v1079_v62 = vsel %vm1075_vm7, %v1059_v55, %v1062_v46  ;;  %v1081_v63 = vsel %vm1077_vm9, %v1065_v48, %v1080_v54 }
 0x24c   : > { %v1086_v0 = vsel %vm1076_vm10, %v1083_v56, %v1085_v57  ;;  %v1089_v1 = vsel %vm1077_vm9, %v1071_v52, %v1088_v61  ;;  %v4695_v2 = vshrl.u32 %v1001_v60, 30  ;;  %v1082_v8 = vsel %vm1076_vm10, %v1079_v62, %v1081_v63 }
 0x24d   : > { %v1090_v3 = vsel %vm1076_vm10, %v1087_v59, %v1089_v1  ;;  %v4697_v4 = vmul.u32.u64.low %v1091_v31, %v1086_v0  ;;  %v4698_v5 = vmul.u32.u64.high %v1091_v31, %v1086_v0, %v4697_v4  ;;  %v1098_v11 = vmul.u32 %v1091_v31, %v1082_v8 }
 0x24e   : > { %v4700_v6 = vmul.u32.u64.low %v1091_v31, %v1090_v3  ;;  %v4701_v7 = vmul.u32.u64.high %v1091_v31, %v1090_v3, %v4700_v6  ;;  %v1003_v47 = vshll.u32 %v4695_v2, 30  ;;  %v996_v26 = vadd.s32 %v4684_v25, %v4681_v24 }
 0x24f   : > { %v1101_v10 = vadd.s32 1, %v4698_v5  ;;  %v1026_v59 = vsub.s32 4, %v4695_v2  ;;  %vm1044_vm1 = vcmp.le.f32.partialorder %v1043_v40, 0.7853982 }
 0x250   : > { %v1004_v9 = vsub.s32 %v1000_v51, %v1003_v47  ;;  %vm1100_vm11 = vc.u32 %v4701_v7, %v4697_v4  ;;  %v1099_v49 = vadd.s32 %v4697_v4, %v4701_v7 }
 0x251   : > { %v1102_v13 = vsel %vm1100_vm11, %v1101_v10, %v4698_v5  ;;  %v1027_v63 = vsel %vm942_vm14, %v1026_v59, %v4695_v2 }
 0x252   : > { %v1006_v12 = vsub.s32 0, %v1004_v9  ;;  %v1103_v14 = vadd.s32 %v1102_v13, %v1098_v11  ;;  %v1029_v29 = vsel %vm941_vm15, 0, %v1027_v63 }
 0x253   : > { %v1239_v6 = vadd.s32 3, %v1029_v29 }
 0x254   : > { %v2945_v15 = vmin.u32 %v1006_v12, %v1004_v9  ;;  %v1104_v16 = vadd.s32 536870912, %v1103_v14 }
 0x255   : > { %v1240_v2 = vand.u32 3, %v1239_v6  ;;  %v3486_v6 = vld [vmem:[#allocation13] sm:$0xff]  }
 0x256   : > { %v1008_v17 = vclz %v2945_v15  ;;  %v1105_v18 = vshrl.u32 %v1104_v16, 30 }
 0x257   : > { %vm1242_vm4 = vcmp.eq.s32.totalorder %v1240_v2, 0  ;;  %vm1245_vm5 = vcmp.eq.s32.totalorder %v1240_v2, 2  ;;  %vm1241_vm8 = vcmp.lt.s32.totalorder %v1240_v2, 2 }
 0x258   : > { %v2946_v19 = vadd.s32 4294967294, %v1008_v17  ;;  %v1106_v20 = vshll.u32 %v1105_v18, 30  ;;  %v1129_v62 = vsub.s32 4, %v1105_v18 }
 0x25a   : > { %vm2947_vm12 = vcmp.lt.s32.totalorder %v2946_v19, 0  ;;  %v1107_v23 = vsub.s32 %v1103_v14, %v1106_v20  ;;  %v1130_v3 = vsel %vm1045_vm0, %v1129_v62, %v1105_v18 }
 0x25b   : > { %v1011_v21 = vsel %vm2947_vm12, 0, %v2946_v19  ;;  %v1132_v5 = vsel %vm1044_vm1, 0, %v1130_v3 }
 0x25c   : > { %v1012_v27 = vsub.s32 32, %v1011_v21  ;;  %v1016_v30 = vsub.s32 4294967266, %v1011_v21  ;;  %v1109_v31 = vsub.s32 0, %v1107_v23  ;;  %v1013_v32 = vshll.u32 %v1004_v9, %v1011_v21 }
 0x25d   : > { %v1343_v8 = vadd.s32 3, %v1132_v5  ;;  %v1033_v9 = vand.u32 3, %v1029_v29  ;;  %v1136_v12 = vand.u32 3, %v1132_v5 }
 0x25e   : > { %v1014_v34 = vshrl.u32 %v996_v26, %v1012_v27  ;;  %v1017_v35 = vadd.s32 127, %v1016_v30  ;;  %v2949_v36 = vmin.u32 %v1109_v31, %v1107_v23 }
 0x25f   : > { %v1344_v13 = vand.u32 3, %v1343_v8  ;;  %vm1035_vm2 = vcmp.eq.s32.totalorder %v1033_v9, 0  ;;  %vm1038_vm3 = vcmp.eq.s32.totalorder %v1033_v9, 2  ;;  %vm1034_vm6 = vcmp.lt.s32.totalorder %v1033_v9, 2  ;;  %v1656_v8 = vld [vmem:[%s5065_s14 + $0x8] sm:$0xff] }
 0x260   : > { %v1015_v37 = vor.u32 %v1014_v34, %v1013_v32  ;;  %v1018_v38 = vshll.u32 %v1017_v35, 23  ;;  %v1111_v39 = vclz %v2949_v36  ;;  %vm1138_vm7 = vcmp.eq.s32.totalorder %v1136_v12, 0 }
 0x261   : > { %vm1141_vm9 = vcmp.eq.s32.totalorder %v1136_v12, 2  ;;  %vm1346_vm10 = vcmp.eq.s32.totalorder %v1344_v13, 0  ;;  %vm1349_vm11 = vcmp.eq.s32.totalorder %v1344_v13, 2  ;;  %vm1137_vm12 = vcmp.lt.s32.totalorder %v1136_v12, 2  ;;  %v2989_v12 = vld [vmem:[%s5066_s2] ss:$0 sm:$0xff] }
 0x262   : > { %v1019_v41 = vor.u32 4788187, %v1018_v38  ;;  %v2950_v42 = vadd.s32 4294967294, %v1111_v39  ;;  %v1022_v44 = vcvt.s32.f32 %v1015_v37 }
 0x264   : > { %v1020_v43 = vand.u32 2147483647, %v1019_v41  ;;  %vm2951_vm13 = vcmp.lt.s32.totalorder %v2950_v42, 0 }
 0x265   : > { %v1114_v48 = vsel %vm2951_vm13, 0, %v2950_v42  ;;  %vm1345_vm13 = vcmp.lt.s32.totalorder %v1344_v13, 2  ;;  %v3479_v42 = vld [vmem:[#allocation10 + $0x8] sm:$0xff]  }
 0x266   : > { %v1023_v46 = vmul.f32 %v1022_v44, %v1020_v43  ;;  %v1115_v24 = vsub.s32 32, %v1114_v48  ;;  %v1119_v25 = vsub.s32 4294967266, %v1114_v48  ;;  %v1116_v45 = vshll.u32 %v1107_v23, %v1114_v48  ;;  %3137 = vmatpush3.bf16.msra.mxu1 %v3479_v42  ;;  %v3480_v43 = vld [vmem:[#allocation10 + $0x10] sm:$0xff]   ;;  %v3483_v44 = vld [vmem:[#allocation10 + $0x28] sm:$0xff]   ;;  %v3485_v48 = vld [vmem:[#allocation10 + $0x38] sm:$0xff]  }
 0x267   : > { %3138 = vmatprep.subr.bf16.mxu1 %v4093_v22 }
 0x268   : > { %v1024_v50 = vxor.u32 2147483648, %v1023_v46  ;;  %v1117_v52 = vshrl.u32 %v1099_v49, %v1115_v24  ;;  %v1120_v51 = vadd.s32 127, %v1119_v25  ;;  %v1735_v49 = vld [vmem:[#allocation4] sm:$0x3]  ;;  %v1732_v24 = vld [vmem:[%s5063_s0] sm:$0xff] }
 0x269   : > { %v1733_v25 = vld [vmem:[%s5064_s6 + $0x8] sm:$0xff] }
 0x26a   : > { %v1025_v53 = vsel %vm942_vm14, %v1024_v50, %v1023_v46  ;;  %v1118_v54 = vor.u32 %v1117_v52, %v1116_v45  ;;  %v1121_v55 = vshll.u32 %v1120_v51, 23  ;;  %vm1032_vm14 = vweird.f32 %v4657_v28  ;;  %3139 = vmatpush3.bf16.msra.mxu1 %v3480_v43  ;;  %v3484_v46 = vld [vmem:[#allocation10 + $0x30] sm:$0xff]   ;;  %v2960_v51 = vld [vmem:[#allocation9] ss:$0 sm:$0xff] }
 0x26b   : > { %v1028_v56 = vsel %vm941_vm15, %v4657_v28, %v1025_v53  ;;  %vm1135_vm15 = vweird.f32 %v4661_v33  ;;  %3140 = vmatprep.subr.bf16.mxu1 %v4093_v22  ;;  %v3481_v28 = vld [vmem:[#allocation10 + $0x18] sm:$0xff]   ;;  %v1734_v45 = vpack.c.bf16 %v1733_v25, %v1732_v24 }
 0x26c   : > { %v1122_v58 = vor.u32 4788187, %v1121_v55  ;;  %v1125_v57 = vcvt.s32.f32 %v1118_v54  ;;  %3489 = vcosq.f32 %v1028_v56 }
 0x26d   : > { %3491 = vsinq.f32 %v1028_v56 }
 0x26e   : > { %v1123_v60 = vand.u32 2147483647, %v1122_v58  ;;  %3141 = vmatpush3.bf16.msra.mxu1 %v3481_v28 }
 0x26f   : > { %3142 = vmatprep.subr.bf16.mxu1 %v4093_v22 }
 0x270   : > { %v1126_v61 = vmul.f32 %v1125_v57, %v1123_v60 }
 0x272   : > { %v1127_v0 = vxor.u32 2147483648, %v1126_v61 }
 0x274   : > { %v1128_v1 = vsel %vm1045_vm0, %v1127_v0, %v1126_v61  ;;  %vm4100_vm0 = vmmov 0  }
 0x275   : > { %v1131_v4 = vsel %vm1044_vm1, %v4661_v33, %v1128_v1  ;;  %v3482_v33 = vld [vmem:[#allocation10 + $0x20] sm:$0xff]   ;;  %3150 = vmatprep.mubr.msk.bf16.mxu1 %vm4100_vm0, %v4093_v22  ;;  %vm1747_vm1 = vcmask 1041408  }
 0x276   : > { %3493 = vcosq.f32 %v1131_v4  ;;  %v3490_v7 = vpop.eup %3489  ;;  %3143 = vmatpush3.bf16.msra.mxu1 %v3482_v33  ;;  %v1749_v50 = vsel %vm1747_vm1, %v1735_v49, 0 }
 0x277   : > { %3495 = vsinq.f32 %v1131_v4  ;;  %v3492_v47 = vpop.eup %3491  ;;  %v1039_v11 = vxor.u32 2147483648, %v3490_v7  ;;  %3144 = vmatprep.subr.bf16.mxu1 %v4093_v22 }
 0x278   : > { %v1036_v10 = vxor.u32 2147483648, %v3492_v47 }
 0x279   : > { %v1040_v15 = vsel %vm1038_vm3, %v1039_v11, %v3492_v47  ;;  %v1247_v17 = vsel %vm1245_vm5, %v1039_v11, %v3492_v47  ;;  %v1655_v47 = vld [vmem:[%s5065_s14] sm:$0xff]  ;;  %vm1673_vm3 = vcmask 130048  }
 0x27a   : > { %v1037_v14 = vsel %vm1035_vm2, %v3490_v7, %v1036_v10  ;;  %v1244_v16 = vsel %vm1242_vm4, %v3490_v7, %v1036_v10  ;;  %3145 = vmatpush3.bf16.msra.mxu1 %v3483_v44  ;;  %vm1743_vm2 = vcmask 31744   ;;  %v1657_v9 = vpack.c.bf16 %v1656_v8, %v1655_v47 }
 0x27b   : > { %v1041_v21 = vsel %vm1034_vm6, %v1037_v14, %v1040_v15  ;;  %v1248_v26 = vsel %vm1241_vm8, %v1244_v16, %v1247_v17  ;;  %3146 = vmatprep.subr.bf16.mxu1 %v4093_v22  ;;  %v2977_v14 = vld [vmem:[#allocation12] ss:$0 sm:$0xff]  ;;  %v2986_v15 = vld [vmem:[#allocation15] ss:$0 sm:$0xff] }
 0x27c   : > { %v1042_v35 = vsel %vm1032_vm14, nan, %v1041_v21  ;;  %v1249_v37 = vsel %vm1032_vm14, nan, %v1248_v26  ;;  %v3246_v16 = vadd.f32 %v2986_v15, %v2977_v14 }
 0x27e   : > { %3147 = vmatpush3.bf16.msra.mxu1 %v3484_v46 }
 0x27f   : > { %3148 = vmatprep.subr.bf16.mxu1 %v4093_v22 }
 0x280   : > { %v3494_v40 = vpop.eup %3493 }
 0x281   : > { %v3496_v18 = vpop.eup %3495  ;;  %v1142_v19 = vxor.u32 2147483648, %v3494_v40 }
 0x282   : > { %v1139_v20 = vxor.u32 2147483648, %v3496_v18  ;;  %3149 = vmatpush3.bf16.msra.mxu1 %v3485_v48 }
 0x283   : > { %v1143_v23 = vsel %vm1141_vm9, %v1142_v19, %v3496_v18  ;;  %v1351_v27 = vsel %vm1349_vm11, %v1142_v19, %v3496_v18  ;;  %3154 = vmatprep.subr.bf16.mxu1 %v4093_v22 }
 0x284   : > { %v1140_v30 = vsel %vm1138_vm7, %v3494_v40, %v1139_v20  ;;  %v1348_v31 = vsel %vm1346_vm10, %v3494_v40, %v1139_v20 }
 0x285   : > { %v1144_v32 = vsel %vm1137_vm12, %v1140_v30, %v1143_v23  ;;  %v1352_v34 = vsel %vm1345_vm13, %v1348_v31, %v1351_v27 }
 0x286   : > { %v1145_v36 = vsel %vm1135_vm15, nan, %v1144_v32  ;;  %v1353_v38 = vsel %vm1135_vm15, nan, %v1352_v34 }
 0x287   : > { %v1355_v39 = vpack.c.bf16 %v1353_v38, %v1249_v37  ;;  %v1354_v41 = vpack.c.bf16 %v1145_v36, %v1042_v35 }
 0x289   : > { %1523 = vmatprep.mubr.bf16.mxu0 %v1355_v39 }
 0x28a   : > { %1524 = vmatmul.mubr.bf16.vlgmr.msra.gmra.mrb[0].mxu0 %v1354_v41 }
 0x28b   : > { %3162 = vmatprep.mubr.msk.bf16.mxu0 %vm4100_vm0, %v4093_v22  ;;  %3161 = vmatpush3.bf16.msra.mxu0 %v1749_v50 }
 0x292   : > { %3163 = vmatmul.mubr.msk.bf16.vlgmr.msra.gmra.mrb[4].mxu0 %vm1743_vm2, %v1734_v45 }
 0x35d   : > { %v3079_v52 = vpop.f32.mrb[0].mxu0 }
 0x35e   : > { %v3080_v53 = vpop.f32.mrb[1].mxu0 }
 0x35f   : > { %v3081_v54 = vadd.f32 %v3080_v53, %v3079_v52  ;;  %v3082_v55 = vpop.f32.mrb[2].mxu0 }
 0x360   : > { %v3083_v56 = vpop.f32.mrb[3].mxu0 }
 0x361   : > { %v1526_v58 = vadd.f32 %v3081_v54, %v2960_v51  ;;  %v3084_v59 = vadd.f32 %v3083_v56, %v3082_v55 }
 0x363   : > { %v1532_v60 = vmul.f32 0.5, %v1526_v58  ;;  %v1529_v57 = vadd.f32 %v3084_v59, %v2960_v51 }
 0x365   : > { %3497 = vtanh.f32 %v1532_v60  ;;  %v1533_v61 = vmul.f32 0.5, %v1529_v57  ;;  %v1785_v2 = vpop.f32.mrb[4].mxu0 }
 0x366   : > { %v3164_v10 = vpop.f32.mrb[5].mxu0 }
 0x367   : > { %3499 = vtanh.f32 %v1533_v61  ;;  %v1788_v11 = vpop.f32.mrb[6].mxu0 }
 0x368   : > { %v3165_v13 = vpop.f32.mrb[7].mxu0  ;;  %v1789_v40 = vadd.f32 %v2989_v12, %v1788_v11 }
 0x36a   : > { %1793 = vst [vmem:[#allocation2 + $0x8] sm:$0xff] %v1789_v40 }
 0x36f   : > { %v3498_v62 = vpop.eup %3497 }
 0x370   : > { %v1536_v63 = vadd.f32 1.0, %v3498_v62 }
 0x371   : > { %v3500_v0 = vpop.eup %3499 }
 0x372   : > { %v1538_v1 = vmul.f32 0.5, %v1536_v63  ;;  %v1537_v29 = vadd.f32 1.0, %v3500_v0 }
 0x374   : > { %v1539_v3 = vmul.f32 0.5, %v1537_v29  ;;  %v1540_v4 = vmul.f32 %v1538_v1, %v1526_v58 }
 0x376   : > { %v1541_v5 = vmul.f32 %v1539_v3, %v1529_v57 }
 0x378   : > { %v1542_v7 = vpack.c.bf16 %v1541_v5, %v1540_v4 }
 0x37a   : > { %3151 = vmatmul.mubr.bf16.vlgmr.msra.gmra.mrb[0].mxu1 %v1542_v7 }
 0x37b   : > { %3155 = vmatpush3.bf16.msra.mxu1 %v3486_v6  ;;  %3156 = vmatprep.mubr.msk.bf16.mxu1 %vm4100_vm0, %v4093_v22  ;;  %v1786_v22 = vadd.f32 %v2989_v12, %v1785_v2 }
 0x37d   : > { %1792 = vst [vmem:[#allocation2] sm:$0xff] %v1786_v22 }
 0x386   : > { %3157 = vmatmul.mubr.msk.bf16.vlgmr.msra.gmra.mrb[0].mxu1 %vm1673_vm3, %v1657_v9 }
 0x459   : > { %v1711_v17 = vpop.f32.mrb[0].mxu1 }
 0x45a   : > { %v3247_v18 = vadd.f32 %v3246_v16, %v1711_v17  ;;  %v3158_v19 = vpop.f32.mrb[1].mxu1 }
 0x45b   : > { %v1714_v20 = vpop.f32.mrb[2].mxu1 }
 0x45c   : > { %v1720_v21 = vmul.f32 0.5, %v3247_v18  ;;  %v3249_v23 = vadd.f32 %v3246_v16, %v1714_v20  ;;  %v3159_v26 = vpop.f32.mrb[3].mxu1 }
 0x45e   : > { %3501 = vtanh.f32 %v1720_v21  ;;  %v1721_v27 = vmul.f32 0.5, %v3249_v23 }
 0x460   : > { %3503 = vtanh.f32 %v1721_v27 }
 0x468   : > { %v3502_v30 = vpop.eup %3501 }
 0x469   : > { %v1724_v31 = vadd.f32 1.0, %v3502_v30 }
 0x46a   : > { %v3504_v32 = vpop.eup %3503 }
 0x46b   : > { %v1726_v34 = vmul.f32 0.5, %v1724_v31  ;;  %v1725_v35 = vadd.f32 1.0, %v3504_v32 }
 0x46d   : > { %v1727_v36 = vmul.f32 0.5, %v1725_v35  ;;  %v1728_v37 = vmul.f32 %v3247_v18, %v1726_v34 }
 0x46f   : > { %v1729_v38 = vmul.f32 %v3249_v23, %v1727_v36 }
 0x471   : > { %v1730_v39 = vpack.c.bf16 %v1729_v38, %v1728_v37 }
 0x473   : > { %1731 = vst [vmem:[#allocation3] sm:$0xff] %v1730_v39 }
 0x474 PF: > { %v4754_v41 = vld [vmem:[#allocation2] sm:$0xff]  ;;  %v4756_v42 = vld [vmem:[#allocation2 + $0x8] sm:$0xff]  ;;  %v3505_v43 = vld [vmem:[%s4630_s24 + $0x4] ss:$12 sps:$4 sm:$0xff]   ;;  %v4101_v33 = vmov 0   ;;  %v4102_v3 = vmov 0.0   ;;  %v2074_v21 = vlaneseq }
 0x475   : > { %2093 = vadd.xlane.f32.xlu0 %v4754_v41  ;;  %v3507_v28 = vld [vmem:[%s4630_s24] ss:$12 sps:$4 sm:$0xff]   ;;  %2022 = vmatprep.mubr.bf16.mxu0 %v4101_v33  ;;  %v3508_v44 = vld [vmem:[%s4630_s24 + $0x1c] ss:$12 sps:$4 sm:$0xff]   ;;  %v3510_v46 = vld [vmem:[%s4630_s24 + $0x18] ss:$12 sps:$4 sm:$0xff]  }
 0x476   : > { %1990 = vmatprep.subr.bf16.mxu0 %v3505_v43  ;;  %v3511_v48 = vld [vmem:[%s4630_s24 + $0x34] ss:$12 sps:$4 sm:$0xff]   ;;  %v3513_v49 = vld [vmem:[%s4630_s24 + $0x30] ss:$12 sps:$4 sm:$0xff]   ;;  %v3514_v24 = vld [vmem:[%s4630_s24 + $0x4c] ss:$12 sps:$4 sm:$0xff]   ;;  %3166 = vmatprep.subr.bf16.mxu1 %v4102_v3 }
 0x477   : > { %1991 = vmatpush1.bf16.msra.mxu0 %v3507_v28  ;;  %v3516_v25 = vld [vmem:[%s4630_s24 + $0x48] ss:$12 sps:$4 sm:$0xff]   ;;  %v3517_v50 = vld [vmem:[%s4630_s24 + $0x64] ss:$12 sps:$4 sm:$0xff]   ;;  %v3519_v45 = vld [vmem:[%s4630_s24 + $0x60] ss:$12 sps:$4 sm:$0xff]  }
 0x478   : > { %1992 = vmatprep.subr.bf16.mxu0 %v3508_v44  ;;  %v3520_v52 = vld [vmem:[%s4630_s24 + $0x7c] ss:$12 sps:$4 sm:$0xff]   ;;  %v3522_v51 = vld [vmem:[%s4630_s24 + $0x78] ss:$12 sps:$4 sm:$0xff]   ;;  %v3523_v53 = vld [vmem:[%s4630_s24 + $0x94] ss:$12 sps:$4 sm:$0xff]  }
 0x479   : > { %2095 = vadd.xlane.f32.xlu0 %v4756_v42  ;;  %v3525_v54 = vld [vmem:[%s4630_s24 + $0x90] ss:$12 sps:$4 sm:$0xff]   ;;  %v3526_v55 = vld [vmem:[%s4630_s24 + $0xac] ss:$12 sps:$4 sm:$0xff]   ;;  %v3528_v56 = vld [vmem:[%s4630_s24 + $0xa8] ss:$12 sps:$4 sm:$0xff]  }
 0x47a   : > { %v4776_v58 = vld [vmem:[#allocation3] sm:$0xff]  ;;  %v3531_v5 = vld [vmem:[%s4643_s7 + $0x10] sm:$0xff]   ;;  %v3532_v6 = vld [vmem:[%s4643_s7 + $0x18] sm:$0xff]   ;;  %vm4103_vm4 = vmmov 0   ;;  %v4833_v27 = vshrl.u32 %v2074_v21, 7 }
 0x47b   : > { %1993 = vmatpush1.bf16.msra.mxu0 %v3510_v46  ;;  %v3529_v29 = vld [vmem:[%s4643_s7] sm:$0xff]   ;;  %v3530_v4 = vld [vmem:[%s4643_s7 + $0x8] sm:$0xff]   ;;  %v3535_v8 = vld [vmem:[%s4643_s7 + $0x30] sm:$0xff]   ;;  %3182 = vmatprep.mubr.msk.bf16.mxu1 %vm4103_vm4, %v4102_v3 }
 0x47c   : > { %1994 = vmatprep.subr.bf16.mxu0 %v3511_v48  ;;  %v3533_v7 = vld [vmem:[%s4643_s7 + $0x20] sm:$0xff]   ;;  %v3534_v47 = vld [vmem:[%s4643_s7 + $0x28] sm:$0xff]   ;;  %v3536_v9 = vld [vmem:[%s4643_s7 + $0x38] sm:$0xff]   ;;  %v2082_v34 = vsub.s32 3, %v4833_v27  ;;  %v2118_v38 = vsub.s32 0, %v4833_v27  ;;  %v2124_v39 = vsub.s32 1, %v4833_v27 }
 0x47d   : > { %v3537_v2 = vld [vmem:[%s4630_s24 + $0x8] ss:$12 sps:$4 sm:$0xff]   ;;  %v3538_v10 = vld [vmem:[%s4630_s24 + $0x20] ss:$12 sps:$4 sm:$0xff]   ;;  %v3539_v11 = vld [vmem:[%s4630_s24 + $0x38] ss:$12 sps:$4 sm:$0xff]  }
 0x47e   : > { %3167 = vmatpush3.bf16.msra.mxu1 %v3537_v2  ;;  %v3540_v12 = vld [vmem:[%s4630_s24 + $0x50] ss:$12 sps:$4 sm:$0xff]   ;;  %v3541_v13 = vld [vmem:[%s4630_s24 + $0x68] ss:$12 sps:$4 sm:$0xff]   ;;  %v3542_v22 = vld [vmem:[%s4630_s24 + $0x80] ss:$12 sps:$4 sm:$0xff]  }
 0x47f   : > { %1995 = vmatpush1.bf16.msra.mxu0 %v3513_v49  ;;  %3168 = vmatprep.subr.bf16.mxu1 %v4102_v3  ;;  %v3543_v40 = vld [vmem:[%s4630_s24 + $0x98] ss:$12 sps:$4 sm:$0xff]   ;;  %v3544_v14 = vld [vmem:[%s4630_s24 + $0xb0] ss:$12 sps:$4 sm:$0xff]   ;;  %v3546_v16 = vld [vmem:[%s4645_s22 + $0x8] sm:$0xff]   ;;  %v2076_v43 = vsub.s32 2, %v4833_v27 }
 0x480   : > { %1996 = vmatprep.subr.bf16.mxu0 %v3514_v24  ;;  %v3545_v15 = vld [vmem:[%s4645_s22] sm:$0xff]   ;;  %s5067_s24 = sld [smem:[#allocation34_spill]] }
 0x481   : > { %v4837_v36 = vld [vmem:[%s4641_s25] sm:$0xff] }
 0x482   : > { %3169 = vmatpush3.bf16.msra.mxu1 %v3538_v10  ;;  %v2083_v37 = vrot.slane %v4837_v36, %v2082_v34  ;;  %v2119_v33 = vrot.slane %v4837_v36, %v2118_v38  ;;  %v2125_v48 = vrot.slane %v4837_v36, %v2124_v39  ;;  %v2077_v49 = vrot.slane %v4837_v36, %v2076_v43 }
 0x483   : > { %1997 = vmatpush1.bf16.msra.mxu0 %v3516_v25  ;;  %3170 = vmatprep.subr.bf16.mxu1 %v4102_v3 }
 0x484   : > { %1998 = vmatprep.subr.bf16.mxu0 %v3517_v50 }
 0x486   : > { %3171 = vmatpush3.bf16.msra.mxu1 %v3539_v11  ;;  %p3031_p1 = scmp.ne.s32.totalorder %s5067_s24, 1 }
 0x487   : > { %1999 = vmatpush1.bf16.msra.mxu0 %v3519_v45  ;;  %3172 = vmatprep.subr.bf16.mxu1 %v4102_v3  ;;  %vm4106_vm5 = vmmov (!%p3031_p1), 0  }
 0x488   : > { %2000 = vmatprep.subr.bf16.mxu0 %v3520_v52 }
 0x48a   : > { %3173 = vmatpush3.bf16.msra.mxu1 %v3540_v12 }
 0x48b   : > { %2001 = vmatpush1.bf16.msra.mxu0 %v3522_v51  ;;  %3174 = vmatprep.subr.bf16.mxu1 %v4102_v3 }
 0x48c   : > { %2002 = vmatprep.subr.bf16.mxu0 %v3523_v53 }
 0x48e   : > { %3175 = vmatpush3.bf16.msra.mxu1 %v3541_v13  ;;  %v2137_v13 = vsub.s32 5, %v4833_v27 }
 0x48f   : > { %2003 = vmatpush1.bf16.msra.mxu0 %v3525_v54  ;;  %3176 = vmatprep.subr.bf16.mxu1 %v4102_v3 }
 0x490   : > { %2004 = vmatprep.subr.bf16.mxu0 %v3526_v55 }
 0x492   : > { %3177 = vmatpush3.bf16.msra.mxu1 %v3542_v22  ;;  %v2138_v22 = vrot.slane %v4837_v36, %v2137_v13 }
 0x493   : > { %2005 = vmatpush1.bf16.msra.mxu0 %v3528_v56  ;;  %3178 = vmatprep.subr.bf16.mxu1 %v4102_v3 }
 0x494   : > { %3186 = vmatprep.subr.bf16.mxu0 %v4102_v3 }
 0x496   : > { %2023 = vmatmul.mubr.bf16.vlgmr.msra.gmra.mrb[0].mxu0 %v4776_v58  ;;  %3179 = vmatpush3.bf16.msra.mxu1 %v3543_v40 }
 0x497   : > { %3187 = vmatpush3.bf16.msra.mxu0 %v3529_v29  ;;  %3202 = vmatprep.mubr.msk.bf16.mxu0 %vm4103_vm4, %v4102_v3  ;;  %v3550_v29 = vld [vmem:[%s4645_s22 + $0x28] sm:$0xff]  }
 0x498   : > { %3188 = vmatprep.subr.bf16.mxu0 %v4102_v3  ;;  %3180 = vmatprep.subr.bf16.mxu1 %v4102_v3 }
 0x49a   : > { %3181 = vmatpush3.bf16.msra.mxu1 %v3544_v14 }
 0x49b   : > { %3189 = vmatpush3.bf16.msra.mxu0 %v3530_v4  ;;  %3206 = vmatprep.subr.bf16.mxu1 %v4102_v3  ;;  %v3551_v4 = vld [vmem:[%s4645_s22 + $0x30] sm:$0xff]  }
 0x49c   : > { %3190 = vmatprep.subr.bf16.mxu0 %v4102_v3 }
 0x49d   : > { %3183 = vmatmul.mubr.bf16.vlgmr.msra.gmra.mrb[0].mxu1 %v4776_v58 }
 0x49e   : > { %3207 = vmatpush3.bf16.msra.mxu1 %v3545_v15  ;;  %3222 = vmatprep.mubr.msk.bf16.mxu1 %vm4103_vm4, %v4102_v3 }
 0x49f   : > { %3191 = vmatpush3.bf16.msra.mxu0 %v3531_v5  ;;  %3208 = vmatprep.subr.bf16.mxu1 %v4102_v3  ;;  %v3552_v5 = vld [vmem:[%s4645_s22 + $0x38] sm:$0xff]  }
 0x4a0   : > { %3192 = vmatprep.subr.bf16.mxu0 %v4102_v3 }
 0x4a2   : > { %3209 = vmatpush3.bf16.msra.mxu1 %v3546_v16 }
 0x4a3   : > { %3193 = vmatpush3.bf16.msra.mxu0 %v3532_v6  ;;  %3210 = vmatprep.subr.bf16.mxu1 %v4102_v3  ;;  %v2088_v6 = vsub.s32 4, %v4833_v27 }
 0x4a4   : > { %3194 = vmatprep.subr.bf16.mxu0 %v4102_v3 }
 0x4a7   : > { %3195 = vmatpush3.bf16.msra.mxu0 %v3533_v7  ;;  %v2089_v7 = vrot.slane %v4837_v36, %v2088_v6  ;;  %v4105_v6 = vmov (!%p3031_p1), 0.0  }
 0x4a8   : > { %3196 = vmatprep.subr.bf16.mxu0 %v4102_v3 }
 0x4ab   : > { %3197 = vmatpush3.bf16.msra.mxu0 %v3534_v47 }
 0x4ac   : > { %3198 = vmatprep.subr.bf16.mxu0 %v4102_v3 }
 0x4af   : > { %3199 = vmatpush3.bf16.msra.mxu0 %v3535_v8 }
 0x4b0   : > { %3200 = vmatprep.subr.bf16.mxu0 %v4102_v3 }
 0x4b3   : > { %3201 = vmatpush3.bf16.msra.mxu0 %v3536_v9 }
 0x502   : > { %v2094_v59 = vpop.xlane.xlu0 %2093 }
 0x503   : > { %v2098_v60 = vmul.f32 0.0078125, %v2094_v59 }
 0x505   : > { %v4780_v57 = vsub.f32 %v4754_v41, %v2098_v60 }
 0x506   : > { %v2096_v61 = vpop.xlane.xlu0 %2095 }
 0x507   : > { %v2099_v62 = vmul.f32 0.0078125, %v2096_v61  ;;  %v2102_v63 = vmul.f32 %v4780_v57, %v4780_v57 }
 0x509   : > { %v4785_v0 = vsub.f32 %v4756_v42, %v2099_v62  ;;  %2104 = vadd.xlane.f32.xlu1 %v2102_v63  ;;  %v3547_v63 = vld [vmem:[%s4645_s22 + $0x10] sm:$0xff]  }
 0x50a   : > { %3211 = vmatpush3.bf16.msra.mxu1 %v3547_v63  ;;  %v3576_v63 = vld [vmem:[#allocation16 + $0x54] ss:$8 sps:$4 sm:$0xff] (!%p3031_p1)  }
 0x50b   : > { %v2103_v1 = vmul.f32 %v4785_v0, %v4785_v0  ;;  %3212 = vmatprep.subr.bf16.mxu1 %v4102_v3 }
 0x50d   : > { %2106 = vadd.xlane.f32.xlu1 %v2103_v1  ;;  %v3549_v1 = vld [vmem:[%s4645_s22 + $0x20] sm:$0xff]  }
 0x569   : > { %v2024_v17 = vpop.f32.mrb[0].mxu0 }
 0x56a   : > { %v2026_v18 = vpop.f32.mrb[1].mxu0  ;;  %v2078_v53 = vadd.f32 %v2077_v49, %v2024_v17 }
 0x56b   : > { %v2028_v19 = vpop.f32.mrb[2].mxu0  ;;  %v2084_v28 = vadd.f32 %v2083_v37, %v2026_v18 }
 0x56c   : > { %v2030_v20 = vpop.f32.mrb[3].mxu0  ;;  %v2079_v60 = vadd.f32 %v2077_v49, %v2028_v19 }
 0x56d   : > { %v2128_v25 = vadd.f32 1.0, %v2084_v28  ;;  %v2085_v52 = vadd.f32 %v2083_v37, %v2030_v20  ;;  %v2241_v37 = vsub.s32 6, %v4833_v27 }
 0x56f   : > { %v2129_v59 = vadd.f32 1.0, %v2085_v52  ;;  %v2242_v43 = vrot.slane %v4837_v36, %v2241_v37 }
 0x570   : > { %v2067_v47 = vpop.f32.mrb[0].mxu1 }
 0x571   : > { %v2090_v8 = vadd.f32 %v2089_v7, %v2067_v47  ;;  %v3184_v9 = vpop.f32.mrb[1].mxu1  ;;  %v2344_v47 = vld [vmem:[#allocation3] sm:$0xff] (!%p3031_p1) }
 0x572   : > { %v2070_v2 = vpop.f32.mrb[2].mxu1 }
 0x573   : > { %v2091_v10 = vadd.f32 %v2089_v7, %v2070_v2  ;;  %v3185_v11 = vpop.f32.mrb[3].mxu1  ;;  %v3584_v7 = vld [vmem:[#allocation16 + $0x70] ss:$8 sps:$4 sm:$0xff] (!%p3031_p1)  }
 0x575   : > { %v2092_v12 = vpack.c.bf16 %v2091_v10, %v2090_v8 }
 0x596   : > { %v2105_v23 = vpop.xlane.xlu1 %2104 }
 0x597   : > { %v2108_v26 = vmul.f32 0.0078125, %v2105_v23 }
 0x599   : > { %v2110_v30 = vadd.f32 1e-06, %v2108_v26 }
 0x59a   : > { %v2107_v31 = vpop.xlane.xlu1 %2106 }
 0x59b   : > { %3553 = vrsqrt.f32 %v2110_v30  ;;  %v2109_v32 = vmul.f32 0.0078125, %v2107_v31 }
 0x59d   : > { %v2111_v35 = vadd.f32 1e-06, %v2109_v32 }
 0x59f   : > { %3555 = vrsqrt.f32 %v2111_v35 }
 0x5a5   : > { %v3554_v44 = vpop.eup %3553 }
 0x5a6   : > { %v2114_v46 = vmul.f32 %v3554_v44, %v4780_v57  ;;  %v2332_v44 = vunpack.c.l.bf16 %v2092_v12 }
 0x5a8   : > { %v2120_v24 = vmul.f32 %v2119_v33, %v2114_v46 }
 0x5a9   : > { %v3556_v50 = vpop.eup %3555 }
 0x5aa   : > { %v2126_v45 = vadd.f32 %v2125_v48, %v2120_v24  ;;  %v2115_v51 = vmul.f32 %v3556_v50, %v4785_v0  ;;  %v3548_v0 = vld [vmem:[%s4645_s22 + $0x18] sm:$0xff]   ;;  %s5068_s22 = sld [smem:[#allocation49_spill]] (!%p3031_p1) }
 0x5ab   : > { %3213 = vmatpush3.bf16.msra.mxu1 %v3548_v0  ;;  %v3578_v0 = vld [vmem:[#allocation16 + $0x50] ss:$8 sps:$4 sm:$0xff] (!%p3031_p1)  }
 0x5ac   : > { %v2130_v54 = vmul.f32 %v2128_v25, %v2126_v45  ;;  %v2121_v55 = vmul.f32 %v2119_v33, %v2115_v51  ;;  %3214 = vmatprep.subr.bf16.mxu1 %v4102_v3  ;;  %v2333_v25 = vunpack.c.h.bf16 %v2092_v12 }
 0x5ae   : > { %v2132_v56 = vadd.f32 %v2130_v54, %v2078_v53  ;;  %v2127_v58 = vadd.f32 %v2125_v48, %v2121_v55  ;;  %v3561_v54 = vld [vmem:[#allocation16 + $0x4] ss:$8 sps:$4 sm:$0xff] (!%p3031_p1)   ;;  %v3563_v55 = vld [vmem:[#allocation16] ss:$8 sps:$4 sm:$0xff] (!%p3031_p1)  }
 0x5af   : > { %3215 = vmatpush3.bf16.msra.mxu1 %v3549_v1  ;;  %2453 = vmatprep.subr.bf16.mxu0 (!%p3031_p1), %v3561_v54  ;;  %v3579_v1 = vld [vmem:[#allocation16 + $0x64] ss:$8 sps:$4 sm:$0xff] (!%p3031_p1)  }
 0x5b0   : > { %v2131_v57 = vmul.f32 %v2129_v59, %v2127_v58  ;;  %3216 = vmatprep.subr.bf16.mxu1 %v4102_v3  ;;  %v3564_v58 = vld [vmem:[#allocation16 + $0x14] ss:$8 sps:$4 sm:$0xff] (!%p3031_p1)   ;;  %v3566_v59 = vld [vmem:[#allocation16 + $0x10] ss:$8 sps:$4 sm:$0xff] (!%p3031_p1)   ;;  %s5069_s13 = smov (!%p3031_p1), %s5068_s22 }
 0x5b2   : > { %v2133_v61 = vadd.f32 %v2131_v57, %v2079_v60  ;;  %v3570_v60 = vld [vmem:[#allocation16 + $0x34] ss:$8 sps:$4 sm:$0xff] (!%p3031_p1)   ;;  %v3572_v57 = vld [vmem:[#allocation16 + $0x30] ss:$8 sps:$4 sm:$0xff] (!%p3031_p1)  }
 0x5b3   : > { %3217 = vmatpush3.bf16.msra.mxu1 %v3550_v29  ;;  %v3581_v29 = vld [vmem:[#allocation16 + $0x60] ss:$8 sps:$4 sm:$0xff] (!%p3031_p1)  }
 0x5b4   : > { %v2134_v62 = vpack.c.bf16 %v2133_v61, %v2132_v56  ;;  %3218 = vmatprep.subr.bf16.mxu1 %v4102_v3  ;;  %v4104_v56 = vmov (!%p3031_p1), 0   ;;  %v3573_v61 = vld [vmem:[#allocation16 + $0x44] ss:$8 sps:$4 sm:$0xff] (!%p3031_p1)  }
 0x5b6   : > { %3203 = vmatmul.mubr.bf16.vlgmr.msra.gmra.mrb[4].mxu0 %v2134_v62  ;;  %v3575_v62 = vld [vmem:[#allocation16 + $0x40] ss:$8 sps:$4 sm:$0xff] (!%p3031_p1)  }
 0x5b7   : > { %3219 = vmatpush3.bf16.msra.mxu1 %v3551_v4  ;;  %2485 = vmatprep.mubr.bf16.mxu0 (!%p3031_p1), %v4104_v56  ;;  %v3582_v4 = vld [vmem:[#allocation16 + $0x74] ss:$8 sps:$4 sm:$0xff] (!%p3031_p1)  }
 0x5b8   : > { %3220 = vmatprep.subr.bf16.mxu1 %v4102_v3  ;;  %2454 = vmatpush1.bf16.msra.mxu0 (!%p3031_p1), %v3563_v55  ;;  %v3048_v55 = vld [vmem:[#allocation19] ss:$0 sm:$0xff] (!%p3031_p1) }
 0x5b9   : > { %2455 = vmatprep.subr.bf16.mxu0 (!%p3031_p1), %v3564_v58 }
 0x5bb   : > { %3221 = vmatpush3.bf16.msra.mxu1 %v3552_v5  ;;  %v3585_v5 = vld [vmem:[%s5068_s22] sm:$0xff] (!%p3031_p1)  }
 0x5bc   : > { %2456 = vmatpush1.bf16.msra.mxu0 (!%p3031_p1), %v3566_v59  ;;  %3226 = vmatprep.subr.bf16.mxu1 (!%p3031_p1), %v4105_v6 }
 0x689   : > { %v2221_v40 = vpop.f32.mrb[4].mxu0 }
 0x68a   : > { %v2222_v14 = vadd.f32 %v2221_v40, %v2138_v22  ;;  %v3204_v3 = vpop.f32.mrb[5].mxu0  ;;  %v3586_v40 = vld [vmem:[%s5069_s13 + $0x8] sm:$0xff] (!%p3031_p1)  }
 0x68b   : > { %v2224_v15 = vpop.f32.mrb[6].mxu0  ;;  %v3588_v3 = vld [vmem:[%s5069_s13 + $0x18] sm:$0xff] (!%p3031_p1)  }
 0x68c   : > { %v2228_v16 = vmul.f32 0.5, %v2222_v14  ;;  %v2225_v17 = vadd.f32 %v2224_v15, %v2138_v22  ;;  %v3205_v18 = vpop.f32.mrb[7].mxu0  ;;  %v3589_v15 = vld [vmem:[%s5069_s13 + $0x20] sm:$0xff] (!%p3031_p1)  }
 0x68d   : > { %v3592_v18 = vld [vmem:[%s5069_s13 + $0x38] sm:$0xff] (!%p3031_p1)  }
 0x68e   : > { %3557 = vtanh.f32 %v2228_v16  ;;  %v2229_v19 = vmul.f32 0.5, %v2225_v17  ;;  %v3590_v16 = vld [vmem:[%s5069_s13 + $0x28] sm:$0xff] (!%p3031_p1)  }
 0x690   : > { %3559 = vtanh.f32 %v2229_v19 }
 0x698   : > { %v3558_v20 = vpop.eup %3557 }
 0x699   : > { %v2232_v21 = vadd.f32 1.0, %v3558_v20 }
 0x69a   : > { %v3560_v23 = vpop.eup %3559 }
 0x69b   : > { %v2234_v26 = vmul.f32 0.5, %v2232_v21  ;;  %v2233_v30 = vadd.f32 1.0, %v3560_v23 }
 0x69d   : > { %v2235_v31 = vmul.f32 0.5, %v2233_v30  ;;  %v2236_v32 = vmul.f32 %v2234_v26, %v2222_v14  ;;  %v3587_v14 = vld [vmem:[%s5069_s13 + $0x10] sm:$0xff] (!%p3031_p1)  }
 0x69f   : > { %v2237_v34 = vmul.f32 %v2235_v31, %v2225_v17  ;;  %v3591_v17 = vld [vmem:[%s5069_s13 + $0x30] sm:$0xff] (!%p3031_p1)  }
 0x6a1   : > { %v2238_v35 = vpack.c.bf16 %v2237_v34, %v2236_v32  ;;  %v2361_v32 = vld [vmem:[#allocation18] sm:$0x3] (!%p3031_p1) }
 0x6a2   : > { %v2370_v37 = vrot.slane (!%p3031_p1), %v2361_v32, %v2124_v39 }
 0x6a3   : > { %3223 = vmatmul.mubr.bf16.vlgmr.msra.gmra.mrb[4].mxu1 %v2238_v35 }
 0x6a4   : > { %3227 = vmatpush3.bf16.msra.mxu1 (!%p3031_p1), %v3585_v5  ;;  %3242 = vmatprep.mubr.msk.bf16.mxu1 (!%p3031_p1), %vm4106_vm5, %v4105_v6 }
 0x6a5   : > { %3228 = vmatprep.subr.bf16.mxu1 (!%p3031_p1), %v4105_v6 }
 0x6a8   : > { %3229 = vmatpush3.bf16.msra.mxu1 (!%p3031_p1), %v3586_v40 }
 0x6a9   : > { %3230 = vmatprep.subr.bf16.mxu1 (!%p3031_p1), %v4105_v6 }
 0x6ac   : > { %3231 = vmatpush3.bf16.msra.mxu1 (!%p3031_p1), %v3587_v14 }
 0x6ad   : > { %3232 = vmatprep.subr.bf16.mxu1 (!%p3031_p1), %v4105_v6 }
 0x6b0   : > { %3233 = vmatpush3.bf16.msra.mxu1 (!%p3031_p1), %v3588_v3 }
 0x6b1   : > { %3234 = vmatprep.subr.bf16.mxu1 (!%p3031_p1), %v4105_v6 }
 0x6b4   : > { %3235 = vmatpush3.bf16.msra.mxu1 (!%p3031_p1), %v3589_v15 }
 0x6b5   : > { %3236 = vmatprep.subr.bf16.mxu1 (!%p3031_p1), %v4105_v6 }
 0x6b8   : > { %3237 = vmatpush3.bf16.msra.mxu1 (!%p3031_p1), %v3590_v16 }
 0x6b9   : > { %3238 = vmatprep.subr.bf16.mxu1 (!%p3031_p1), %v4105_v6 }
 0x6bc   : > { %3239 = vmatpush3.bf16.msra.mxu1 (!%p3031_p1), %v3591_v17 }
 0x6bd   : > { %3240 = vmatprep.subr.bf16.mxu1 (!%p3031_p1), %v4105_v6 }
 0x6c0   : > { %3241 = vmatpush3.bf16.msra.mxu1 (!%p3031_p1), %v3592_v18 }
 0x776   : > { %v2325_v28 = vpop.f32.mrb[4].mxu1 }
 0x777   : > { %v2326_v33 = vadd.f32 %v2325_v28, %v2242_v43  ;;  %v3224_v46 = vpop.f32.mrb[5].mxu1 }
 0x778   : > { %v2328_v48 = vpop.f32.mrb[6].mxu1 }
 0x779   : > { %v2334_v49 = vmul.f32 %v2332_v44, %v2326_v33  ;;  %v2329_v24 = vadd.f32 %v2328_v48, %v2242_v43  ;;  %v3225_v50 = vpop.f32.mrb[7].mxu1  ;;  %2343 = sbr.rel (%p3031_p1) target bundleno = 2459 (0x99b), region = 156  ;;  %v2366_v33 = vrot.slane (!%p3031_p1), %v2361_v32, %v2118_v38 }
 0x77b   : > { %v2336_v45 = vadd.f32 %v2334_v49, %v4754_v41  ;;  %v2335_v52 = vmul.f32 %v2333_v25, %v2329_v24  ;;  %v3567_v41 = vld [vmem:[#allocation16 + $0x24] ss:$8 sps:$4 sm:$0xff] (!%p3031_p1)  }
 0x77c   : > { %2457 = vmatprep.subr.bf16.mxu0 (!%p3031_p1), %v3567_v41 }
 0x77d   : > { %2338 = vst [vmem:[#allocation2] sm:$0xff] %v2336_v45  ;;  %v2337_v51 = vadd.f32 %v2335_v52, %v4756_v42  ;;  %v3569_v42 = vld [vmem:[#allocation16 + $0x20] ss:$8 sps:$4 sm:$0xff] (!%p3031_p1)  }
 0x77e   : > { %2458 = vmatpush1.bf16.msra.mxu0 (!%p3031_p1), %v3569_v42 }
 0x77f   : > { %2339 = vst [vmem:[#allocation2 + $0x8] sm:$0xff] %v2337_v51  ;;  %2459 = vmatprep.subr.bf16.mxu0 (!%p3031_p1), %v3570_v60 }
 0x782   : > { %2460 = vmatpush1.bf16.msra.mxu0 %v3572_v57 }
 0x783   : > { %2461 = vmatprep.subr.bf16.mxu0 %v3573_v61 }
 0x784   : > { %v2496_v36 = vld [vmem:[#allocation2] sm:$0xff] }
 0x785   : > { %2498 = vadd.xlane.f32.xlu0 %v2496_v36 }
 0x786   : > { %v2497_v53 = vld [vmem:[#allocation2 + $0x8] sm:$0xff]  ;;  %2462 = vmatpush1.bf16.msra.mxu0 %v3575_v62 }
 0x787   : > { %2463 = vmatprep.subr.bf16.mxu0 %v3576_v63 }
 0x789   : > { %2500 = vadd.xlane.f32.xlu0 %v2497_v53 }
 0x78a   : > { %2464 = vmatpush1.bf16.msra.mxu0 %v3578_v0 }
 0x78b   : > { %2465 = vmatprep.subr.bf16.mxu0 %v3579_v1 }
 0x78e   : > { %2466 = vmatpush1.bf16.msra.mxu0 %v3581_v29 }
 0x78f   : > { %2467 = vmatprep.subr.bf16.mxu0 %v3582_v4 }
 0x792   : > { %2468 = vmatpush1.bf16.msra.mxu0 %v3584_v7 }
 0x795   : > { %2486 = vmatmul.mubr.bf16.vlgmr.msra.gmra.mrb[0].mxu0 %v2344_v47 }
 0x812   : > { %v2499_v8 = vpop.xlane.xlu0 %2498 }
 0x813   : > { %v2502_v9 = vmul.f32 0.0078125, %v2499_v8 }
 0x815   : > { %v2504_v2 = vsub.f32 %v2496_v36, %v2502_v9 }
 0x816   : > { %v2501_v10 = vpop.xlane.xlu0 %2500 }
 0x817   : > { %v2503_v11 = vmul.f32 0.0078125, %v2501_v10  ;;  %v2506_v12 = vmul.f32 %v2504_v2, %v2504_v2 }
 0x819   : > { %v2505_v13 = vsub.f32 %v2497_v53, %v2503_v11  ;;  %2508 = vadd.xlane.f32.xlu1 %v2506_v12 }
 0x81b   : > { %v2507_v22 = vmul.f32 %v2505_v13, %v2505_v13 }
 0x81d   : > { %2510 = vadd.xlane.f32.xlu1 %v2507_v22 }
 0x868   : > { %v2487_v19 = vpop.f32.mrb[0].mxu0 }
 0x869   : > { %v2489_v20 = vpop.f32.mrb[1].mxu0  ;;  %v2488_v24 = vadd.f32 %v2487_v19, %v2366_v33 }
 0x86a   : > { %v2491_v21 = vpop.f32.mrb[2].mxu0  ;;  %v2490_v28 = vadd.f32 %v2489_v20, %v2370_v37 }
 0x86b   : > { %v2493_v23 = vpop.f32.mrb[3].mxu0  ;;  %v2492_v36 = vadd.f32 %v2491_v21, %v2366_v33 }
 0x86c   : > { %v2520_v44 = vadd.f32 1.0, %v2490_v28  ;;  %v2494_v49 = vadd.f32 %v2493_v23, %v2370_v37 }
 0x86e   : > { %v2521_v51 = vadd.f32 1.0, %v2494_v49 }
 0x8a6   : > { %v2509_v26 = vpop.xlane.xlu1 %2508 }
 0x8a7   : > { %v2512_v30 = vmul.f32 0.0078125, %v2509_v26 }
 0x8a9   : > { %v2514_v31 = vadd.f32 1e-06, %v2512_v30 }
 0x8aa   : > { %v2511_v34 = vpop.xlane.xlu1 %2510 }
 0x8ab   : > { %3593 = vrsqrt.f32 %v2514_v31  ;;  %v2513_v35 = vmul.f32 0.0078125, %v2511_v34 }
 0x8ad   : > { %v2515_v43 = vadd.f32 1e-06, %v2513_v35 }
 0x8af   : > { %3595 = vrsqrt.f32 %v2515_v43 }
 0x8b5   : > { %v3594_v46 = vpop.eup %3593 }
 0x8b6   : > { %v2518_v48 = vmul.f32 %v3594_v46, %v2504_v2 }
 0x8b8   : > { %v2522_v25 = vmul.f32 %v2520_v44, %v2518_v48 }
 0x8b9   : > { %v3596_v50 = vpop.eup %3595 }
 0x8ba   : > { %v2524_v45 = vadd.f32 %v2522_v25, %v2488_v24  ;;  %v2519_v52 = vmul.f32 %v3596_v50, %v2505_v13 }
 0x8bc   : > { %v2523_v53 = vmul.f32 %v2521_v51, %v2519_v52 }
 0x8be   : > { %v2525_v54 = vadd.f32 %v2523_v53, %v2492_v36 }
 0x8c0   : > { %v2526_v39 = vpack.c.bf16 %v2525_v54, %v2524_v45 }
 0x8c2   : > { %3243 = vmatmul.mubr.bf16.vlgmr.msra.gmra.mrb[0].mxu1 %v2526_v39 }
 0x995   : > { %v2632_v56 = vpop.f32.mrb[0].mxu1 }
 0x996   : > { %v2633_v58 = vadd.f32 %v3048_v55, %v2632_v56  ;;  %v3244_v27 = vpop.f32.mrb[1].mxu1 }
 0x997   : > { %v2635_v38 = vpop.f32.mrb[2].mxu1 }
 0x998   : > { %2639 = vst [vmem:[#allocation24] sm:$0xff] %v2633_v58  ;;  %v2636_v59 = vadd.f32 %v3048_v55, %v2635_v38  ;;  %v3245_v41 = vpop.f32.mrb[3].mxu1 }
 0x99a   : > { %2640 = vst [vmem:[#allocation24 + $0x8] sm:$0xff] %v2636_v59 }
 0x99b PF: > { %s5070_s25 = sld [smem:[#allocation36_spill]]  ;;  %s4107_s7 = smov [#allocation24]  }
 0x99c   : > { %s2650_s22 = sshll.u32 %s4107_s7, 4  ;;  %s2651_s22 = int_to_ptr.vmem [resolvable:$true] %s2650_s22 }
 0x99d   : > { %s3967_s21 = scalar_lea.vmem %s2651_s22, 256  ;;  %p3974_p13 = scmp.lt.s32.totalorder %s2651_s22, %s2651_s22 }
 0x99e   : > { %p3968_p6 = scmp.ne.s32.totalorder %s2651_s22, %s3967_s21  ;;  %p3975_p9 = scmp.lt.s32.totalorder %s3967_s21, %s3967_s21 }
 0x9a0   : > { %p3976_p10 = por %p3975_p9, %p3974_p13 }
 0x9a1   : > { %p3377_p5 = scmp.eq.s32.totalorder %s5070_s25, 1 }
 0x9a3   : > { %p3969_p8 = pnand %p3968_p6, %p3377_p5 }
 0x9a5   : > { %p3970_p0 = pneg %p3969_p8 }
 0x9a7   : > { %p3977_p7 = pnand %p3976_p10, %p3970_p0 }
 0x9a9   : > { %3980 = shalt.err (!%p3977_p7)
}
 0x9aa   : > { %s5071_s0 = sld [smem:[#allocation53_spill]] }
 0x9b0   : > { %s5072_s18 = smov %s5071_s0  ;;  %s3981_s19 = scalar_lea.hbm %s5071_s0, 256 }
 0x9b1   : > { %p3982_p11 = scmp.ne.s32.totalorder %s5072_s18, %s3981_s19  ;;  %p3987_p4 = scmp.lt.u32.totalorder %s3981_s19, %s5072_s18 }
 0x9b3   : > { %p3983_p2 = pnand %p3982_p11, %p3377_p5 }
 0x9b5   : > { %p3984_p12 = pneg %p3983_p2 }
 0x9b7   : > { %p3989_p3 = pnand %p3987_p4, %p3984_p12 }
 0x9b9   : > { %3992 = shalt.err (!%p3989_p3)
}
 0x9ba   : > { %s4108_s27 = smov 128   ;;  %s4109_s5 = smov 8  }
 0x9bb   : > { %3312 = dma.vmem_to_hbm [thread:$0]  (%p3377_p5), %s2651_s22, 256, %s5072_s18, [#allocation6], %s4108_s27, %s4108_s27, %s4109_s5  }
 0x9bc   : > { %4046 = dma.done.wait (%p3377_p5), [#allocation6], 256  }
 0x9bd   : > { %4048 = vsyncadd (%p3377_p5), [#allocation6], 4294967040 }
 0x9be PF: > { %s5073_s7 = sld [smem:[#allocation35_spill]]  ;;  %s5074_s0 = sld [smem:[#allocation33_spill]] }
 0x9bf   : > { %s5075_s21 = sld [smem:[#allocation40_spill]]  ;;  %s5076_s26 = sld [smem:[#allocation38_spill]] }
 0x9c0   : > { %s5077_s30 = smov %s4059_s20 }
 0x9c4   : > { %s36_s22 = sadd.s32 1, %s5073_s7  }
 0x9c5   : > { %p33_p1 = scmp.ge.s32.totalorder %s36_s22, 4   ;;  %s5078_s20 = smov %s5075_s21 }
 0x9c6   : > { %s5079_s21 = smov %s4067_s1  ;;  %s5080_s1 = smov %s5076_s26 }
 0x9c7   :  { %35 = sbr.rel (!%p33_p1) target bundleno = 23 (0x17), region = 215 }
 0x9ce   :  { %2666 = vsyncpa [#allocation5], 1 }
 0x9cf   :  { %2668 = vsyncpa [#allocation5 + $0x1], 1 }
 0x9d0   :  { %2669 = vsyncpa [#allocation8], 1 }
 0x9d1   :  { %2670 = vsyncpa [#allocation11], 1 }
 0x9d2   :  { %2671 = vsyncpa [#allocation14], 1 }
 0x9d3   :  { %2672 = vsyncpa [#allocation17], 1 }
 0x9d4   :  { %2673 = vsyncpa [#allocation20], 1 }
 0x9d5   :  { %2674 = vsyncpa [#allocation6], 1 }
 0x9d6   :  { %2676 = vsyncpa [#allocation6 + $0x1], 1 }

</bundles_post_ra>
